<compile_context>
chip_gen: v7x
topology: tpu7x:2x2x1
jax: 0.10.0
libtpu: 0.0.40
codegen_flags: <defaults>
</compile_context>

<pallas_src>
import functools

import jax
import jax.numpy as jnp
from jax import lax
from jax.experimental import pallas as pl
from jax.experimental.pallas import tpu as pltpu

LN_EPS = 1e-5


def _layernorm(x, gamma, beta):
    mu = jnp.mean(x, axis=-1, keepdims=True)
    var = jnp.mean((x - mu) ** 2, axis=-1, keepdims=True)
    return (x - mu) * lax.rsqrt(var + LN_EPS) * gamma + beta


def _gelu_exact(x):
    # PyTorch nn.GELU() default = exact erf formulation.
    return 0.5 * x * (1.0 + lax.erf(x * (1.0 / jnp.sqrt(2.0).astype(x.dtype))))


def block_kernel(num_heads,
                 x_ref,
                 g1_ref, b1_ref,
                 wqkv_ref,
                 wproj_ref, bproj_ref,
                 g2_ref, b2_ref,
                 wfc1_ref, bfc1_ref,
                 wfc2_ref, bfc2_ref,
                 attn_row0_ref, x_out_ref,
                 ov_scratch):
    x = x_ref[0]                      # (N, C) f32
    N, C = x.shape
    H = num_heads
    hd = C // H

    # ---- norm1 + QKV projection (qkv_bias=False) ----
    # wqkv already has the softmax scale folded into its q-columns (param prep).
    xn = _layernorm(x, g1_ref[0], b1_ref[0])
    qkv = jnp.dot(xn.astype(jnp.bfloat16), wqkv_ref[...],
                  preferred_element_type=jnp.float32)            # (N, 3C) f32
    qkv_bf = qkv.astype(jnp.bfloat16)                            # single bf16 cast

    # ---- multi-head attention ----
    # Per-head softmax(qk^T) and p@v; each head's (N, hd) output is written into a
    # (N, C) bf16 scratch so the output projection is one full-K MXU matmul.
    # Only row 0 of the head-averaged attention map is kept (all the caller uses).
    attn_row0 = jnp.zeros((1, N), jnp.float32)
    for h in range(H):                                           # H is small & static
        q = qkv_bf[:, h * hd:(h + 1) * hd]                       # scale pre-folded
        k = qkv_bf[:, C + h * hd:C + (h + 1) * hd]
        v = qkv_bf[:, 2 * C + h * hd:2 * C + (h + 1) * hd]

        # Contract over the feature dim directly (no explicit k.T / XLU transpose).
        s = lax.dot_general(q, k,
                            dimension_numbers=(((1,), (1,)), ((), ())),
                            preferred_element_type=jnp.float32)   # (N, N) f32
        s = s - jnp.max(s, axis=-1, keepdims=True)
        p = jnp.exp(s)
        # Exact reciprocal: avg_attn is an exported output (review concern).
        p = p * pl.reciprocal(jnp.sum(p, axis=-1, keepdims=True), approx=False)

        attn_row0 = attn_row0 + p[0:1, :]

        ov = jnp.dot(p.astype(jnp.bfloat16), v,
                     preferred_element_type=jnp.float32)          # (N, hd) f32
        ov_scratch[:, h * hd:(h + 1) * hd] = ov.astype(jnp.bfloat16)

    attn_row0_ref[0] = attn_row0 * (1.0 / H)        # row 0 of avg attention map

    # One full-K output projection (K = C) instead of H short-K matmuls.
    x_proj = jnp.dot(ov_scratch[...], wproj_ref[...],
                     preferred_element_type=jnp.float32)          # (N, C) f32
    x1 = x + x_proj + bproj_ref[0]                  # residual 1 (+ proj bias, once)

    # ---- norm2 + MLP (Linear -> exact GELU -> Linear) ----
    xn2 = _layernorm(x1, g2_ref[0], b2_ref[0])
    h1 = jnp.dot(xn2.astype(jnp.bfloat16), wfc1_ref[...],
                 preferred_element_type=jnp.float32) + bfc1_ref[0]
    h1 = _gelu_exact(h1)
    h2 = jnp.dot(h1.astype(jnp.bfloat16), wfc2_ref[...],
                 preferred_element_type=jnp.float32) + bfc2_ref[0]

    x_out_ref[0] = x1 + h2                          # residual 2


def _vmem_limit_bytes(kparams, N, C, hidden):
    """Generation-aware VMEM budget: actual working set + margin, capped vs HW."""
    param_bytes = sum(int(v.size) * v.dtype.itemsize for v in kparams.values())
    act_bytes = (N * 3 * C * (4 + 2)      # qkv f32 + its bf16 copy
                 + 4 * N * C * 4          # xn / x_proj / x1 / xn2 f32
                 + N * hidden * 4         # mlp hidden f32
                 + 3 * N * N * 4          # s / p intermediates (one head live)
                 + N * C * 2)             # ov scratch (bf16)
    io_bytes = 2 * 2 * (N * C * 4) + 2 * N * 4   # double-buffered x in/out + attn row
    need = param_bytes + act_bytes + io_bytes
    try:
        cap = int(pltpu.get_tpu_info().vmem_capacity_bytes)
    except Exception:  # pragma: no cover - conservative fallback
        cap = 64 * 1024 * 1024
    # 2x margin for (8,128) tile padding + Mosaic internal scratch, 16 MiB floor,
    # never claim more than ~70% of physical VMEM (v7x has only 64 MiB per TC).
    return int(min(max(2 * need, 16 * 1024 * 1024), int(0.70 * cap)))


def block_forward(x, kparams, num_heads):
    """x: (B, N, C) f32, kparams from prepare_params().
    Returns (avg_attn[:, 0, 1:], x_out) matching the PyTorch Block."""
    B, N, C = x.shape
    hidden = kparams["wfc1"].shape[1]

    def const_spec(arr):
        nd = arr.ndim
        # Constant index_map => single-buffer (double-buffering = dead VMEM).
        return pl.BlockSpec(arr.shape, lambda b: (0,) * nd,
                            pipeline_mode=pl.Buffered(1))

    grid_spec = pltpu.PrefetchScalarGridSpec(
        num_scalar_prefetch=0,
        grid=(B,),
        in_specs=[
            pl.BlockSpec((1, N, C), lambda b: (b, 0, 0)),     # x
            const_spec(kparams["g1"]), const_spec(kparams["b1"]),
            const_spec(kparams["wqkv"]),
            const_spec(kparams["wproj"]), const_spec(kparams["bproj"]),
            const_spec(kparams["g2"]), const_spec(kparams["b2"]),
            const_spec(kparams["wfc1"]), const_spec(kparams["bfc1"]),
            const_spec(kparams["wfc2"]), const_spec(kparams["bfc2"]),
        ],
        out_specs=[
            pl.BlockSpec((1, 1, N), lambda b: (b, 0, 0)),     # avg attn, row 0 only
            pl.BlockSpec((1, N, C), lambda b: (b, 0, 0)),     # x out
        ],
        scratch_shapes=[pltpu.VMEM((N, C), jnp.bfloat16)],    # per-head ov assembly
    )

    # Advisory cost estimate so XLA schedules around the custom call sensibly
    # (at small B the kernel is weight-DMA-latency-bound; overlap matters).
    flops = 2 * B * N * (3 * C * C + 2 * N * C + C * C + 2 * C * hidden)
    transcendentals = B * (num_heads * N * N + N * hidden)
    param_bytes = sum(int(v.size) * v.dtype.itemsize for v in kparams.values())
    bytes_accessed = (int(x.size) * x.dtype.itemsize + param_bytes
                      + B * N * C * 4 + B * N * 4)
    cost = pl.CostEstimate(flops=int(flops),
                           transcendentals=int(transcendentals),
                           bytes_accessed=int(bytes_accessed))

    attn_row0, x_out = pl.pallas_call(
        functools.partial(block_kernel, num_heads),
        grid_spec=grid_spec,
        out_shape=(
            jax.ShapeDtypeStruct((B, 1, N), jnp.float32),
            jax.ShapeDtypeStruct((B, N, C), jnp.float32),
        ),
        compiler_params=pltpu.CompilerParams(
            dimension_semantics=("parallel",),
            vmem_limit_bytes=_vmem_limit_bytes(kparams, N, C, hidden)),
        cost_estimate=cost,
    )(x,
      kparams["g1"], kparams["b1"],
      kparams["wqkv"],
      kparams["wproj"], kparams["bproj"],
      kparams["g2"], kparams["b2"],
      kparams["wfc1"], kparams["bfc1"],
      kparams["wfc2"], kparams["bfc2"])

    # glue: avg_attn[:, 0, 1:]  (same slicing as the PyTorch module)
    return attn_row0[:, 0, 1:], x_out


def init_params(key, dim, mlp_ratio=4.0):
    """Raw f32 parameters (weights stored pre-transposed for x @ W)."""
    hidden = int(dim * mlp_ratio)
    ks = jax.random.split(key, 8)
    std = 0.02
    return {
        "g1": jnp.ones((1, dim), jnp.float32),
        "b1": jnp.zeros((1, dim), jnp.float32),
        "g2": jnp.ones((1, dim), jnp.float32),
        "b2": jnp.zeros((1, dim), jnp.float32),
        "wqkv": std * jax.random.normal(ks[0], (dim, 3 * dim), jnp.float32),
        "wproj": std * jax.random.normal(ks[1], (dim, dim), jnp.float32),
        "bproj": std * jax.random.normal(ks[2], (1, dim), jnp.float32),
        "wfc1": std * jax.random.normal(ks[3], (dim, hidden), jnp.float32),
        "bfc1": std * jax.random.normal(ks[4], (1, hidden), jnp.float32),
        "wfc2": std * jax.random.normal(ks[5], (hidden, dim), jnp.float32),
        "bfc2": std * jax.random.normal(ks[6], (1, dim), jnp.float32),
    }


def prepare_params(raw, num_heads):
    """One-time host prep: fold softmax scale into the q-columns of wqkv and cast
    matmul weights to bf16 (MXU operands; halves weight DMA + VMEM)."""
    dim = raw["wqkv"].shape[0]
    hd = dim // num_heads
    scale = float(hd) ** -0.5
    wqkv = raw["wqkv"].at[:, :dim].multiply(scale)
    return {
        "g1": raw["g1"], "b1": raw["b1"], "g2": raw["g2"], "b2": raw["b2"],
        "wqkv": wqkv.astype(jnp.bfloat16),
        "wproj": raw["wproj"].astype(jnp.bfloat16),
        "bproj": raw["bproj"],
        "wfc1": raw["wfc1"].astype(jnp.bfloat16),
        "bfc1": raw["bfc1"],
        "wfc2": raw["wfc2"].astype(jnp.bfloat16),
        "bfc2": raw["bfc2"],
    }


def reference_forward(x, p, num_heads):
    """Pure-JAX f32 reference mirroring the PyTorch code (raw f32 weights)."""
    B, N, C = x.shape
    hd = C // num_heads
    scale = hd ** -0.5

    def ln(v, g, b):
        mu = jnp.mean(v, -1, keepdims=True)
        var = jnp.mean((v - mu) ** 2, -1, keepdims=True)
        return (v - mu) / jnp.sqrt(var + LN_EPS) * g + b

    xn = ln(x, p["g1"][0], p["b1"][0])
    qkv = (xn @ p["wqkv"]).reshape(B, N, 3, num_heads, hd).transpose(2, 0, 3, 1, 4)
    q, k, v = qkv[0], qkv[1], qkv[2]
    attn = jax.nn.softmax(jnp.einsum("bhnd,bhmd->bhnm", q, k) * scale, axis=-1)
    avg_attn = attn.mean(axis=1)
    xo = jnp.einsum("bhnm,bhmd->bhnd", attn, v).transpose(0, 2, 1, 3).reshape(B, N, C)
    xo = xo @ p["wproj"] + p["bproj"][0]
    x1 = x + xo
    xn2 = ln(x1, p["g2"][0], p["b2"][0])
    h = xn2 @ p["wfc1"] + p["bfc1"][0]
    h = 0.5 * h * (1.0 + lax.erf(h / jnp.sqrt(2.0)))
    h = h @ p["wfc2"] + p["bfc2"][0]
    return avg_attn[:, 0, 1:], x1 + h


if __name__ == "__main__":
    B, N, C = 2, 8, 32
    NUM_HEADS = 8

    key = jax.random.PRNGKey(0)
    kx, kp = jax.random.split(key)
    x = jax.random.normal(kx, (B, N, C), jnp.float32)
    raw_params = init_params(kp, C)
    kparams = prepare_params(raw_params, NUM_HEADS)

    avg_attn, x_out = block_forward(x, kparams, NUM_HEADS)
    jax.block_until_ready((avg_attn, x_out))

    # Correctness sanity check vs. pure-JAX f32 reference (true f32 weights, so the
    # bf16 weight quantization used by the kernel is included in the error budget).
    ref_attn, ref_x = reference_forward(x, raw_params, NUM_HEADS)
    assert avg_attn.shape == (B, N - 1) and x_out.shape == (B, N, C)
    assert jnp.allclose(avg_attn, ref_attn, atol=1e-2, rtol=1e-2)
    assert jnp.allclose(x_out, ref_x, atol=1e-2, rtol=1e-2)

    print("KERNEL_OK")
</pallas_src>

<mosaic_0001>
module attributes {stable_mosaic.version = 11 : i64} {
  func.func @block_kernel(%arg0: i32, %arg1: memref<1x8x32xf32, #tpu.memory_space<vmem>>, %arg2: memref<1x32xf32, #tpu.memory_space<vmem>>, %arg3: memref<1x32xf32, #tpu.memory_space<vmem>>, %arg4: memref<32x96xbf16, #tpu.memory_space<vmem>>, %arg5: memref<32x32xbf16, #tpu.memory_space<vmem>>, %arg6: memref<1x32xf32, #tpu.memory_space<vmem>>, %arg7: memref<1x32xf32, #tpu.memory_space<vmem>>, %arg8: memref<1x32xf32, #tpu.memory_space<vmem>>, %arg9: memref<32x128xbf16, #tpu.memory_space<vmem>>, %arg10: memref<1x128xf32, #tpu.memory_space<vmem>>, %arg11: memref<128x32xbf16, #tpu.memory_space<vmem>>, %arg12: memref<1x32xf32, #tpu.memory_space<vmem>>, %arg13: memref<1x1x8xf32, #tpu.memory_space<vmem>>, %arg14: memref<1x8x32xf32, #tpu.memory_space<vmem>>, %arg15: memref<8x32xbf16, #tpu.memory_space<vmem>>) attributes {dimension_semantics = [#tpu.dimension_semantics<parallel>], iteration_bounds = array<i64: 2>, scalar_prefetch = 0 : i64, scratch_operands = 1 : i64, tpu.core_type = #tpu.core_type<tc>, window_params = [{transform_indices = @transform_0, window_bounds = array<i64: 1, 8, 32>}, {pipeline_mode = #tpu.pipeline_mode<synchronous>, transform_indices = @transform_1, window_bounds = array<i64: 1, 32>}, {pipeline_mode = #tpu.pipeline_mode<synchronous>, transform_indices = @transform_2, window_bounds = array<i64: 1, 32>}, {pipeline_mode = #tpu.pipeline_mode<synchronous>, transform_indices = @transform_3, window_bounds = array<i64: 32, 96>}, {pipeline_mode = #tpu.pipeline_mode<synchronous>, transform_indices = @transform_4, window_bounds = array<i64: 32, 32>}, {pipeline_mode = #tpu.pipeline_mode<synchronous>, transform_indices = @transform_5, window_bounds = array<i64: 1, 32>}, {pipeline_mode = #tpu.pipeline_mode<synchronous>, transform_indices = @transform_6, window_bounds = array<i64: 1, 32>}, {pipeline_mode = #tpu.pipeline_mode<synchronous>, transform_indices = @transform_7, window_bounds = array<i64: 1, 32>}, {pipeline_mode = #tpu.pipeline_mode<synchronous>, transform_indices = @transform_8, window_bounds = array<i64: 32, 128>}, {pipeline_mode = #tpu.pipeline_mode<synchronous>, transform_indices = @transform_9, window_bounds = array<i64: 1, 128>}, {pipeline_mode = #tpu.pipeline_mode<synchronous>, transform_indices = @transform_10, window_bounds = array<i64: 128, 32>}, {pipeline_mode = #tpu.pipeline_mode<synchronous>, transform_indices = @transform_11, window_bounds = array<i64: 1, 32>}, {transform_indices = @transform_12, window_bounds = array<i64: 1, 1, 8>}, {transform_indices = @transform_13, window_bounds = array<i64: 1, 8, 32>}]} {
    %c0 = arith.constant 0 : index
    %c0_0 = arith.constant 0 : index
    %c0_1 = arith.constant 0 : index
    %0 = vector.load %arg1[%c0, %c0_0, %c0_1] : memref<1x8x32xf32, #tpu.memory_space<vmem>>, vector<1x8x32xf32>
    %1 = vector.shape_cast %0 : vector<1x8x32xf32> to vector<8x32xf32>
    %c0_2 = arith.constant 0 : index
    %c0_3 = arith.constant 0 : index
    %2 = vector.load %arg2[%c0_2, %c0_3] : memref<1x32xf32, #tpu.memory_space<vmem>>, vector<1x32xf32>
    %3 = vector.shape_cast %2 : vector<1x32xf32> to vector<32xf32>
    %c0_4 = arith.constant 0 : index
    %c0_5 = arith.constant 0 : index
    %4 = vector.load %arg3[%c0_4, %c0_5] : memref<1x32xf32, #tpu.memory_space<vmem>>, vector<1x32xf32>
    %5 = vector.shape_cast %4 : vector<1x32xf32> to vector<32xf32>
    %cst = arith.constant dense<0.000000e+00> : vector<8xf32>
    %6 = vector.multi_reduction <add>, %1, %cst [1] : vector<8x32xf32> to vector<8xf32>
    %7 = vector.shape_cast %6 : vector<8xf32> to vector<8x1xf32>
    %cst_6 = arith.constant 3.200000e+01 : f32
    %8 = vector.broadcast %cst_6 : f32 to vector<8x1xf32>
    %9 = arith.divf %7, %8 : vector<8x1xf32>
    %10 = vector.broadcast %9 : vector<8x1xf32> to vector<8x32xf32>
    %11 = arith.subf %1, %10 : vector<8x32xf32>
    %12 = arith.mulf %11, %11 : vector<8x32xf32>
    %cst_7 = arith.constant dense<0.000000e+00> : vector<8xf32>
    %13 = vector.multi_reduction <add>, %12, %cst_7 [1] : vector<8x32xf32> to vector<8xf32>
    %14 = vector.shape_cast %13 : vector<8xf32> to vector<8x1xf32>
    %cst_8 = arith.constant 3.200000e+01 : f32
    %15 = vector.broadcast %cst_8 : f32 to vector<8x1xf32>
    %16 = arith.divf %14, %15 : vector<8x1xf32>
    %17 = vector.broadcast %9 : vector<8x1xf32> to vector<8x32xf32>
    %18 = arith.subf %1, %17 : vector<8x32xf32>
    %cst_9 = arith.constant 9.99999974E-6 : f32
    %19 = vector.broadcast %cst_9 : f32 to vector<8x1xf32>
    %20 = arith.addf %16, %19 : vector<8x1xf32>
    %21 = math.rsqrt %20 : vector<8x1xf32>
    %22 = vector.broadcast %21 : vector<8x1xf32> to vector<8x32xf32>
    %23 = arith.mulf %18, %22 : vector<8x32xf32>
    %24 = vector.shape_cast %3 : vector<32xf32> to vector<1x32xf32>
    %25 = vector.broadcast %24 : vector<1x32xf32> to vector<8x32xf32>
    %26 = arith.mulf %23, %25 : vector<8x32xf32>
    %27 = vector.shape_cast %5 : vector<32xf32> to vector<1x32xf32>
    %28 = vector.broadcast %27 : vector<1x32xf32> to vector<8x32xf32>
    %29 = arith.addf %26, %28 : vector<8x32xf32>
    %30 = arith.truncf %29 : vector<8x32xf32> to vector<8x32xbf16>
    %c0_10 = arith.constant 0 : index
    %c0_11 = arith.constant 0 : index
    %31 = vector.load %arg4[%c0_10, %c0_11] : memref<32x96xbf16, #tpu.memory_space<vmem>>, vector<32x96xbf16>
    %cst_12 = arith.constant dense<0.000000e+00> : vector<8x96xf32>
    %32 = tpu.matmul %30, %31, %cst_12 {dimension_numbers = #tpu.dot_dimension_numbers<[1], [0], [0], [1], [0, 0, 1, 1], [], []>} : vector<8x32xbf16>, vector<32x96xbf16>, vector<8x96xf32> -> vector<8x96xf32>
    %33 = arith.truncf %32 : vector<8x96xf32> to vector<8x96xbf16>
    %cst_13 = arith.constant 0.000000e+00 : f32
    %34 = vector.broadcast %cst_13 : f32 to vector<1x8xf32>
    %35 = vector.extract_strided_slice %33 {offsets = [0, 0], sizes = [8, 4], strides = [1, 1]} : vector<8x96xbf16> to vector<8x4xbf16>
    %36 = vector.extract_strided_slice %33 {offsets = [0, 32], sizes = [8, 4], strides = [1, 1]} : vector<8x96xbf16> to vector<8x4xbf16>
    %37 = vector.extract_strided_slice %33 {offsets = [0, 64], sizes = [8, 4], strides = [1, 1]} : vector<8x96xbf16> to vector<8x4xbf16>
    %cst_14 = arith.constant dense<0.000000e+00> : vector<8x8xf32>
    %38 = tpu.matmul %35, %36, %cst_14 {dimension_numbers = #tpu.dot_dimension_numbers<[1], [1], [0], [0], [0, 0, 1, 0], [], []>} : vector<8x4xbf16>, vector<8x4xbf16>, vector<8x8xf32> -> vector<8x8xf32>
    %cst_15 = arith.constant dense<0xFF800000> : vector<8xf32>
    %39 = vector.multi_reduction <maximumf>, %38, %cst_15 [1] : vector<8x8xf32> to vector<8xf32>
    %40 = vector.shape_cast %39 : vector<8xf32> to vector<8x1xf32>
    %41 = vector.broadcast %40 : vector<8x1xf32> to vector<8x8xf32>
    %42 = arith.subf %38, %41 : vector<8x8xf32>
    %43 = math.exp %42 : vector<8x8xf32>
    %cst_16 = arith.constant dense<0.000000e+00> : vector<8xf32>
    %44 = vector.multi_reduction <add>, %43, %cst_16 [1] : vector<8x8xf32> to vector<8xf32>
    %45 = vector.shape_cast %44 : vector<8xf32> to vector<8x1xf32>
    %46 = tpu.reciprocal %45 : vector<8x1xf32> -> vector<8x1xf32>
    %47 = vector.broadcast %46 : vector<8x1xf32> to vector<8x8xf32>
    %48 = arith.mulf %43, %47 : vector<8x8xf32>
    %49 = vector.extract_strided_slice %48 {offsets = [0, 0], sizes = [1, 8], strides = [1, 1]} : vector<8x8xf32> to vector<1x8xf32>
    %50 = arith.addf %34, %49 : vector<1x8xf32>
    %51 = arith.truncf %48 : vector<8x8xf32> to vector<8x8xbf16>
    %cst_17 = arith.constant dense<0.000000e+00> : vector<8x4xf32>
    %52 = tpu.matmul %51, %37, %cst_17 {dimension_numbers = #tpu.dot_dimension_numbers<[1], [0], [0], [1], [0, 0, 1, 1], [], []>} : vector<8x8xbf16>, vector<8x4xbf16>, vector<8x4xf32> -> vector<8x4xf32>
    %53 = arith.truncf %52 : vector<8x4xf32> to vector<8x4xbf16>
    %c0_18 = arith.constant 0 : index
    %c0_19 = arith.constant 0 : index
    %54 = vector.load %arg15[%c0_18, %c0_19] : memref<8x32xbf16, #tpu.memory_space<vmem>>, vector<8x4xbf16>
    tpu.vector_store %arg15[%c0_18, %c0_19], %53 {strides = array<i32>} : memref<8x32xbf16, #tpu.memory_space<vmem>>, vector<8x4xbf16>,
    %55 = vector.extract_strided_slice %33 {offsets = [0, 4], sizes = [8, 4], strides = [1, 1]} : vector<8x96xbf16> to vector<8x4xbf16>
    %56 = vector.extract_strided_slice %33 {offsets = [0, 36], sizes = [8, 4], strides = [1, 1]} : vector<8x96xbf16> to vector<8x4xbf16>
    %57 = vector.extract_strided_slice %33 {offsets = [0, 68], sizes = [8, 4], strides = [1, 1]} : vector<8x96xbf16> to vector<8x4xbf16>
    %cst_20 = arith.constant dense<0.000000e+00> : vector<8x8xf32>
    %58 = tpu.matmul %55, %56, %cst_20 {dimension_numbers = #tpu.dot_dimension_numbers<[1], [1], [0], [0], [0, 0, 1, 0], [], []>} : vector<8x4xbf16>, vector<8x4xbf16>, vector<8x8xf32> -> vector<8x8xf32>
    %cst_21 = arith.constant dense<0xFF800000> : vector<8xf32>
    %59 = vector.multi_reduction <maximumf>, %58, %cst_21 [1] : vector<8x8xf32> to vector<8xf32>
    %60 = vector.shape_cast %59 : vector<8xf32> to vector<8x1xf32>
    %61 = vector.broadcast %60 : vector<8x1xf32> to vector<8x8xf32>
    %62 = arith.subf %58, %61 : vector<8x8xf32>
    %63 = math.exp %62 : vector<8x8xf32>
    %cst_22 = arith.constant dense<0.000000e+00> : vector<8xf32>
    %64 = vector.multi_reduction <add>, %63, %cst_22 [1] : vector<8x8xf32> to vector<8xf32>
    %65 = vector.shape_cast %64 : vector<8xf32> to vector<8x1xf32>
    %66 = tpu.reciprocal %65 : vector<8x1xf32> -> vector<8x1xf32>
    %67 = vector.broadcast %66 : vector<8x1xf32> to vector<8x8xf32>
    %68 = arith.mulf %63, %67 : vector<8x8xf32>
    %69 = vector.extract_strided_slice %68 {offsets = [0, 0], sizes = [1, 8], strides = [1, 1]} : vector<8x8xf32> to vector<1x8xf32>
    %70 = arith.addf %50, %69 : vector<1x8xf32>
    %71 = arith.truncf %68 : vector<8x8xf32> to vector<8x8xbf16>
    %cst_23 = arith.constant dense<0.000000e+00> : vector<8x4xf32>
    %72 = tpu.matmul %71, %57, %cst_23 {dimension_numbers = #tpu.dot_dimension_numbers<[1], [0], [0], [1], [0, 0, 1, 1], [], []>} : vector<8x8xbf16>, vector<8x4xbf16>, vector<8x4xf32> -> vector<8x4xf32>
    %73 = arith.truncf %72 : vector<8x4xf32> to vector<8x4xbf16>
    %c0_24 = arith.constant 0 : index
    %c4 = arith.constant 4 : index
    %74 = vector.load %arg15[%c0_24, %c4] : memref<8x32xbf16, #tpu.memory_space<vmem>>, vector<8x4xbf16>
    tpu.vector_store %arg15[%c0_24, %c4], %73 {strides = array<i32>} : memref<8x32xbf16, #tpu.memory_space<vmem>>, vector<8x4xbf16>,
    %75 = vector.extract_strided_slice %33 {offsets = [0, 8], sizes = [8, 4], strides = [1, 1]} : vector<8x96xbf16> to vector<8x4xbf16>
    %76 = vector.extract_strided_slice %33 {offsets = [0, 40], sizes = [8, 4], strides = [1, 1]} : vector<8x96xbf16> to vector<8x4xbf16>
    %77 = vector.extract_strided_slice %33 {offsets = [0, 72], sizes = [8, 4], strides = [1, 1]} : vector<8x96xbf16> to vector<8x4xbf16>
    %cst_25 = arith.constant dense<0.000000e+00> : vector<8x8xf32>
    %78 = tpu.matmul %75, %76, %cst_25 {dimension_numbers = #tpu.dot_dimension_numbers<[1], [1], [0], [0], [0, 0, 1, 0], [], []>} : vector<8x4xbf16>, vector<8x4xbf16>, vector<8x8xf32> -> vector<8x8xf32>
    %cst_26 = arith.constant dense<0xFF800000> : vector<8xf32>
    %79 = vector.multi_reduction <maximumf>, %78, %cst_26 [1] : vector<8x8xf32> to vector<8xf32>
    %80 = vector.shape_cast %79 : vector<8xf32> to vector<8x1xf32>
    %81 = vector.broadcast %80 : vector<8x1xf32> to vector<8x8xf32>
    %82 = arith.subf %78, %81 : vector<8x8xf32>
    %83 = math.exp %82 : vector<8x8xf32>
    %cst_27 = arith.constant dense<0.000000e+00> : vector<8xf32>
    %84 = vector.multi_reduction <add>, %83, %cst_27 [1] : vector<8x8xf32> to vector<8xf32>
    %85 = vector.shape_cast %84 : vector<8xf32> to vector<8x1xf32>
    %86 = tpu.reciprocal %85 : vector<8x1xf32> -> vector<8x1xf32>
    %87 = vector.broadcast %86 : vector<8x1xf32> to vector<8x8xf32>
    %88 = arith.mulf %83, %87 : vector<8x8xf32>
    %89 = vector.extract_strided_slice %88 {offsets = [0, 0], sizes = [1, 8], strides = [1, 1]} : vector<8x8xf32> to vector<1x8xf32>
    %90 = arith.addf %70, %89 : vector<1x8xf32>
    %91 = arith.truncf %88 : vector<8x8xf32> to vector<8x8xbf16>
    %cst_28 = arith.constant dense<0.000000e+00> : vector<8x4xf32>
    %92 = tpu.matmul %91, %77, %cst_28 {dimension_numbers = #tpu.dot_dimension_numbers<[1], [0], [0], [1], [0, 0, 1, 1], [], []>} : vector<8x8xbf16>, vector<8x4xbf16>, vector<8x4xf32> -> vector<8x4xf32>
    %93 = arith.truncf %92 : vector<8x4xf32> to vector<8x4xbf16>
    %c0_29 = arith.constant 0 : index
    %c8 = arith.constant 8 : index
    %94 = vector.load %arg15[%c0_29, %c8] : memref<8x32xbf16, #tpu.memory_space<vmem>>, vector<8x4xbf16>
    tpu.vector_store %arg15[%c0_29, %c8], %93 {strides = array<i32>} : memref<8x32xbf16, #tpu.memory_space<vmem>>, vector<8x4xbf16>,
    %95 = vector.extract_strided_slice %33 {offsets = [0, 12], sizes = [8, 4], strides = [1, 1]} : vector<8x96xbf16> to vector<8x4xbf16>
    %96 = vector.extract_strided_slice %33 {offsets = [0, 44], sizes = [8, 4], strides = [1, 1]} : vector<8x96xbf16> to vector<8x4xbf16>
    %97 = vector.extract_strided_slice %33 {offsets = [0, 76], sizes = [8, 4], strides = [1, 1]} : vector<8x96xbf16> to vector<8x4xbf16>
    %cst_30 = arith.constant dense<0.000000e+00> : vector<8x8xf32>
    %98 = tpu.matmul %95, %96, %cst_30 {dimension_numbers = #tpu.dot_dimension_numbers<[1], [1], [0], [0], [0, 0, 1, 0], [], []>} : vector<8x4xbf16>, vector<8x4xbf16>, vector<8x8xf32> -> vector<8x8xf32>
    %cst_31 = arith.constant dense<0xFF800000> : vector<8xf32>
    %99 = vector.multi_reduction <maximumf>, %98, %cst_31 [1] : vector<8x8xf32> to vector<8xf32>
    %100 = vector.shape_cast %99 : vector<8xf32> to vector<8x1xf32>
    %101 = vector.broadcast %100 : vector<8x1xf32> to vector<8x8xf32>
    %102 = arith.subf %98, %101 : vector<8x8xf32>
    %103 = math.exp %102 : vector<8x8xf32>
    %cst_32 = arith.constant dense<0.000000e+00> : vector<8xf32>
    %104 = vector.multi_reduction <add>, %103, %cst_32 [1] : vector<8x8xf32> to vector<8xf32>
    %105 = vector.shape_cast %104 : vector<8xf32> to vector<8x1xf32>
    %106 = tpu.reciprocal %105 : vector<8x1xf32> -> vector<8x1xf32>
    %107 = vector.broadcast %106 : vector<8x1xf32> to vector<8x8xf32>
    %108 = arith.mulf %103, %107 : vector<8x8xf32>
    %109 = vector.extract_strided_slice %108 {offsets = [0, 0], sizes = [1, 8], strides = [1, 1]} : vector<8x8xf32> to vector<1x8xf32>
    %110 = arith.addf %90, %109 : vector<1x8xf32>
    %111 = arith.truncf %108 : vector<8x8xf32> to vector<8x8xbf16>
    %cst_33 = arith.constant dense<0.000000e+00> : vector<8x4xf32>
    %112 = tpu.matmul %111, %97, %cst_33 {dimension_numbers = #tpu.dot_dimension_numbers<[1], [0], [0], [1], [0, 0, 1, 1], [], []>} : vector<8x8xbf16>, vector<8x4xbf16>, vector<8x4xf32> -> vector<8x4xf32>
    %113 = arith.truncf %112 : vector<8x4xf32> to vector<8x4xbf16>
    %c0_34 = arith.constant 0 : index
    %c12 = arith.constant 12 : index
    %114 = vector.load %arg15[%c0_34, %c12] : memref<8x32xbf16, #tpu.memory_space<vmem>>, vector<8x4xbf16>
    tpu.vector_store %arg15[%c0_34, %c12], %113 {strides = array<i32>} : memref<8x32xbf16, #tpu.memory_space<vmem>>, vector<8x4xbf16>,
    %115 = vector.extract_strided_slice %33 {offsets = [0, 16], sizes = [8, 4], strides = [1, 1]} : vector<8x96xbf16> to vector<8x4xbf16>
    %116 = vector.extract_strided_slice %33 {offsets = [0, 48], sizes = [8, 4], strides = [1, 1]} : vector<8x96xbf16> to vector<8x4xbf16>
    %117 = vector.extract_strided_slice %33 {offsets = [0, 80], sizes = [8, 4], strides = [1, 1]} : vector<8x96xbf16> to vector<8x4xbf16>
    %cst_35 = arith.constant dense<0.000000e+00> : vector<8x8xf32>
    %118 = tpu.matmul %115, %116, %cst_35 {dimension_numbers = #tpu.dot_dimension_numbers<[1], [1], [0], [0], [0, 0, 1, 0], [], []>} : vector<8x4xbf16>, vector<8x4xbf16>, vector<8x8xf32> -> vector<8x8xf32>
    %cst_36 = arith.constant dense<0xFF800000> : vector<8xf32>
    %119 = vector.multi_reduction <maximumf>, %118, %cst_36 [1] : vector<8x8xf32> to vector<8xf32>
    %120 = vector.shape_cast %119 : vector<8xf32> to vector<8x1xf32>
    %121 = vector.broadcast %120 : vector<8x1xf32> to vector<8x8xf32>
    %122 = arith.subf %118, %121 : vector<8x8xf32>
    %123 = math.exp %122 : vector<8x8xf32>
    %cst_37 = arith.constant dense<0.000000e+00> : vector<8xf32>
    %124 = vector.multi_reduction <add>, %123, %cst_37 [1] : vector<8x8xf32> to vector<8xf32>
    %125 = vector.shape_cast %124 : vector<8xf32> to vector<8x1xf32>
    %126 = tpu.reciprocal %125 : vector<8x1xf32> -> vector<8x1xf32>
    %127 = vector.broadcast %126 : vector<8x1xf32> to vector<8x8xf32>
    %128 = arith.mulf %123, %127 : vector<8x8xf32>
    %129 = vector.extract_strided_slice %128 {offsets = [0, 0], sizes = [1, 8], strides = [1, 1]} : vector<8x8xf32> to vector<1x8xf32>
    %130 = arith.addf %110, %129 : vector<1x8xf32>
    %131 = arith.truncf %128 : vector<8x8xf32> to vector<8x8xbf16>
    %cst_38 = arith.constant dense<0.000000e+00> : vector<8x4xf32>
    %132 = tpu.matmul %131, %117, %cst_38 {dimension_numbers = #tpu.dot_dimension_numbers<[1], [0], [0], [1], [0, 0, 1, 1], [], []>} : vector<8x8xbf16>, vector<8x4xbf16>, vector<8x4xf32> -> vector<8x4xf32>
    %133 = arith.truncf %132 : vector<8x4xf32> to vector<8x4xbf16>
    %c0_39 = arith.constant 0 : index
    %c16 = arith.constant 16 : index
    %134 = vector.load %arg15[%c0_39, %c16] : memref<8x32xbf16, #tpu.memory_space<vmem>>, vector<8x4xbf16>
    tpu.vector_store %arg15[%c0_39, %c16], %133 {strides = array<i32>} : memref<8x32xbf16, #tpu.memory_space<vmem>>, vector<8x4xbf16>,
    %135 = vector.extract_strided_slice %33 {offsets = [0, 20], sizes = [8, 4], strides = [1, 1]} : vector<8x96xbf16> to vector<8x4xbf16>
    %136 = vector.extract_strided_slice %33 {offsets = [0, 52], sizes = [8, 4], strides = [1, 1]} : vector<8x96xbf16> to vector<8x4xbf16>
    %137 = vector.extract_strided_slice %33 {offsets = [0, 84], sizes = [8, 4], strides = [1, 1]} : vector<8x96xbf16> to vector<8x4xbf16>
    %cst_40 = arith.constant dense<0.000000e+00> : vector<8x8xf32>
    %138 = tpu.matmul %135, %136, %cst_40 {dimension_numbers = #tpu.dot_dimension_numbers<[1], [1], [0], [0], [0, 0, 1, 0], [], []>} : vector<8x4xbf16>, vector<8x4xbf16>, vector<8x8xf32> -> vector<8x8xf32>
    %cst_41 = arith.constant dense<0xFF800000> : vector<8xf32>
    %139 = vector.multi_reduction <maximumf>, %138, %cst_41 [1] : vector<8x8xf32> to vector<8xf32>
    %140 = vector.shape_cast %139 : vector<8xf32> to vector<8x1xf32>
    %141 = vector.broadcast %140 : vector<8x1xf32> to vector<8x8xf32>
    %142 = arith.subf %138, %141 : vector<8x8xf32>
    %143 = math.exp %142 : vector<8x8xf32>
    %cst_42 = arith.constant dense<0.000000e+00> : vector<8xf32>
    %144 = vector.multi_reduction <add>, %143, %cst_42 [1] : vector<8x8xf32> to vector<8xf32>
    %145 = vector.shape_cast %144 : vector<8xf32> to vector<8x1xf32>
    %146 = tpu.reciprocal %145 : vector<8x1xf32> -> vector<8x1xf32>
    %147 = vector.broadcast %146 : vector<8x1xf32> to vector<8x8xf32>
    %148 = arith.mulf %143, %147 : vector<8x8xf32>
    %149 = vector.extract_strided_slice %148 {offsets = [0, 0], sizes = [1, 8], strides = [1, 1]} : vector<8x8xf32> to vector<1x8xf32>
    %150 = arith.addf %130, %149 : vector<1x8xf32>
    %151 = arith.truncf %148 : vector<8x8xf32> to vector<8x8xbf16>
    %cst_43 = arith.constant dense<0.000000e+00> : vector<8x4xf32>
    %152 = tpu.matmul %151, %137, %cst_43 {dimension_numbers = #tpu.dot_dimension_numbers<[1], [0], [0], [1], [0, 0, 1, 1], [], []>} : vector<8x8xbf16>, vector<8x4xbf16>, vector<8x4xf32> -> vector<8x4xf32>
    %153 = arith.truncf %152 : vector<8x4xf32> to vector<8x4xbf16>
    %c0_44 = arith.constant 0 : index
    %c20 = arith.constant 20 : index
    %154 = vector.load %arg15[%c0_44, %c20] : memref<8x32xbf16, #tpu.memory_space<vmem>>, vector<8x4xbf16>
    tpu.vector_store %arg15[%c0_44, %c20], %153 {strides = array<i32>} : memref<8x32xbf16, #tpu.memory_space<vmem>>, vector<8x4xbf16>,
    %155 = vector.extract_strided_slice %33 {offsets = [0, 24], sizes = [8, 4], strides = [1, 1]} : vector<8x96xbf16> to vector<8x4xbf16>
    %156 = vector.extract_strided_slice %33 {offsets = [0, 56], sizes = [8, 4], strides = [1, 1]} : vector<8x96xbf16> to vector<8x4xbf16>
    %157 = vector.extract_strided_slice %33 {offsets = [0, 88], sizes = [8, 4], strides = [1, 1]} : vector<8x96xbf16> to vector<8x4xbf16>
    %cst_45 = arith.constant dense<0.000000e+00> : vector<8x8xf32>
    %158 = tpu.matmul %155, %156, %cst_45 {dimension_numbers = #tpu.dot_dimension_numbers<[1], [1], [0], [0], [0, 0, 1, 0], [], []>} : vector<8x4xbf16>, vector<8x4xbf16>, vector<8x8xf32> -> vector<8x8xf32>
    %cst_46 = arith.constant dense<0xFF800000> : vector<8xf32>
    %159 = vector.multi_reduction <maximumf>, %158, %cst_46 [1] : vector<8x8xf32> to vector<8xf32>
    %160 = vector.shape_cast %159 : vector<8xf32> to vector<8x1xf32>
    %161 = vector.broadcast %160 : vector<8x1xf32> to vector<8x8xf32>
    %162 = arith.subf %158, %161 : vector<8x8xf32>
    %163 = math.exp %162 : vector<8x8xf32>
    %cst_47 = arith.constant dense<0.000000e+00> : vector<8xf32>
    %164 = vector.multi_reduction <add>, %163, %cst_47 [1] : vector<8x8xf32> to vector<8xf32>
    %165 = vector.shape_cast %164 : vector<8xf32> to vector<8x1xf32>
    %166 = tpu.reciprocal %165 : vector<8x1xf32> -> vector<8x1xf32>
    %167 = vector.broadcast %166 : vector<8x1xf32> to vector<8x8xf32>
    %168 = arith.mulf %163, %167 : vector<8x8xf32>
    %169 = vector.extract_strided_slice %168 {offsets = [0, 0], sizes = [1, 8], strides = [1, 1]} : vector<8x8xf32> to vector<1x8xf32>
    %170 = arith.addf %150, %169 : vector<1x8xf32>
    %171 = arith.truncf %168 : vector<8x8xf32> to vector<8x8xbf16>
    %cst_48 = arith.constant dense<0.000000e+00> : vector<8x4xf32>
    %172 = tpu.matmul %171, %157, %cst_48 {dimension_numbers = #tpu.dot_dimension_numbers<[1], [0], [0], [1], [0, 0, 1, 1], [], []>} : vector<8x8xbf16>, vector<8x4xbf16>, vector<8x4xf32> -> vector<8x4xf32>
    %173 = arith.truncf %172 : vector<8x4xf32> to vector<8x4xbf16>
    %c0_49 = arith.constant 0 : index
    %c24 = arith.constant 24 : index
    %174 = vector.load %arg15[%c0_49, %c24] : memref<8x32xbf16, #tpu.memory_space<vmem>>, vector<8x4xbf16>
    tpu.vector_store %arg15[%c0_49, %c24], %173 {strides = array<i32>} : memref<8x32xbf16, #tpu.memory_space<vmem>>, vector<8x4xbf16>,
    %175 = vector.extract_strided_slice %33 {offsets = [0, 28], sizes = [8, 4], strides = [1, 1]} : vector<8x96xbf16> to vector<8x4xbf16>
    %176 = vector.extract_strided_slice %33 {offsets = [0, 60], sizes = [8, 4], strides = [1, 1]} : vector<8x96xbf16> to vector<8x4xbf16>
    %177 = vector.extract_strided_slice %33 {offsets = [0, 92], sizes = [8, 4], strides = [1, 1]} : vector<8x96xbf16> to vector<8x4xbf16>
    %cst_50 = arith.constant dense<0.000000e+00> : vector<8x8xf32>
    %178 = tpu.matmul %175, %176, %cst_50 {dimension_numbers = #tpu.dot_dimension_numbers<[1], [1], [0], [0], [0, 0, 1, 0], [], []>} : vector<8x4xbf16>, vector<8x4xbf16>, vector<8x8xf32> -> vector<8x8xf32>
    %cst_51 = arith.constant dense<0xFF800000> : vector<8xf32>
    %179 = vector.multi_reduction <maximumf>, %178, %cst_51 [1] : vector<8x8xf32> to vector<8xf32>
    %180 = vector.shape_cast %179 : vector<8xf32> to vector<8x1xf32>
    %181 = vector.broadcast %180 : vector<8x1xf32> to vector<8x8xf32>
    %182 = arith.subf %178, %181 : vector<8x8xf32>
    %183 = math.exp %182 : vector<8x8xf32>
    %cst_52 = arith.constant dense<0.000000e+00> : vector<8xf32>
    %184 = vector.multi_reduction <add>, %183, %cst_52 [1] : vector<8x8xf32> to vector<8xf32>
    %185 = vector.shape_cast %184 : vector<8xf32> to vector<8x1xf32>
    %186 = tpu.reciprocal %185 : vector<8x1xf32> -> vector<8x1xf32>
    %187 = vector.broadcast %186 : vector<8x1xf32> to vector<8x8xf32>
    %188 = arith.mulf %183, %187 : vector<8x8xf32>
    %189 = vector.extract_strided_slice %188 {offsets = [0, 0], sizes = [1, 8], strides = [1, 1]} : vector<8x8xf32> to vector<1x8xf32>
    %190 = arith.addf %170, %189 : vector<1x8xf32>
    %191 = arith.truncf %188 : vector<8x8xf32> to vector<8x8xbf16>
    %cst_53 = arith.constant dense<0.000000e+00> : vector<8x4xf32>
    %192 = tpu.matmul %191, %177, %cst_53 {dimension_numbers = #tpu.dot_dimension_numbers<[1], [0], [0], [1], [0, 0, 1, 1], [], []>} : vector<8x8xbf16>, vector<8x4xbf16>, vector<8x4xf32> -> vector<8x4xf32>
    %193 = arith.truncf %192 : vector<8x4xf32> to vector<8x4xbf16>
    %c0_54 = arith.constant 0 : index
    %c28 = arith.constant 28 : index
    %194 = vector.load %arg15[%c0_54, %c28] : memref<8x32xbf16, #tpu.memory_space<vmem>>, vector<8x4xbf16>
    tpu.vector_store %arg15[%c0_54, %c28], %193 {strides = array<i32>} : memref<8x32xbf16, #tpu.memory_space<vmem>>, vector<8x4xbf16>,
    %cst_55 = arith.constant 1.250000e-01 : f32
    %195 = vector.broadcast %cst_55 : f32 to vector<1x8xf32>
    %196 = arith.mulf %190, %195 : vector<1x8xf32>
    %c0_56 = arith.constant 0 : index
    %c0_57 = arith.constant 0 : index
    %c0_58 = arith.constant 0 : index
    %197 = vector.load %arg13[%c0_56, %c0_57, %c0_58] : memref<1x1x8xf32, #tpu.memory_space<vmem>>, vector<1x1x8xf32>
    %198 = vector.shape_cast %197 : vector<1x1x8xf32> to vector<1x8xf32>
    %199 = vector.shape_cast %196 : vector<1x8xf32> to vector<1x1x8xf32>
    tpu.vector_store %arg13[%c0_56, %c0_57, %c0_58], %199 {strides = array<i32>} : memref<1x1x8xf32, #tpu.memory_space<vmem>>, vector<1x1x8xf32>,
    %c0_59 = arith.constant 0 : index
    %c0_60 = arith.constant 0 : index
    %200 = vector.load %arg15[%c0_59, %c0_60] : memref<8x32xbf16, #tpu.memory_space<vmem>>, vector<8x32xbf16>
    %c0_61 = arith.constant 0 : index
    %c0_62 = arith.constant 0 : index
    %201 = vector.load %arg5[%c0_61, %c0_62] : memref<32x32xbf16, #tpu.memory_space<vmem>>, vector<32x32xbf16>
    %cst_63 = arith.constant dense<0.000000e+00> : vector<8x32xf32>
    %202 = tpu.matmul %200, %201, %cst_63 {dimension_numbers = #tpu.dot_dimension_numbers<[1], [0], [0], [1], [0, 0, 1, 1], [], []>} : vector<8x32xbf16>, vector<32x32xbf16>, vector<8x32xf32> -> vector<8x32xf32>
    %203 = arith.addf %1, %202 : vector<8x32xf32>
    %c0_64 = arith.constant 0 : index
    %c0_65 = arith.constant 0 : index
    %204 = vector.load %arg6[%c0_64, %c0_65] : memref<1x32xf32, #tpu.memory_space<vmem>>, vector<1x32xf32>
    %205 = vector.shape_cast %204 : vector<1x32xf32> to vector<32xf32>
    %206 = vector.shape_cast %205 : vector<32xf32> to vector<1x32xf32>
    %207 = vector.broadcast %206 : vector<1x32xf32> to vector<8x32xf32>
    %208 = arith.addf %203, %207 : vector<8x32xf32>
    %c0_66 = arith.constant 0 : index
    %c0_67 = arith.constant 0 : index
    %209 = vector.load %arg7[%c0_66, %c0_67] : memref<1x32xf32, #tpu.memory_space<vmem>>, vector<1x32xf32>
    %210 = vector.shape_cast %209 : vector<1x32xf32> to vector<32xf32>
    %c0_68 = arith.constant 0 : index
    %c0_69 = arith.constant 0 : index
    %211 = vector.load %arg8[%c0_68, %c0_69] : memref<1x32xf32, #tpu.memory_space<vmem>>, vector<1x32xf32>
    %212 = vector.shape_cast %211 : vector<1x32xf32> to vector<32xf32>
    %cst_70 = arith.constant dense<0.000000e+00> : vector<8xf32>
    %213 = vector.multi_reduction <add>, %208, %cst_70 [1] : vector<8x32xf32> to vector<8xf32>
    %214 = vector.shape_cast %213 : vector<8xf32> to vector<8x1xf32>
    %cst_71 = arith.constant 3.200000e+01 : f32
    %215 = vector.broadcast %cst_71 : f32 to vector<8x1xf32>
    %216 = arith.divf %214, %215 : vector<8x1xf32>
    %217 = vector.broadcast %216 : vector<8x1xf32> to vector<8x32xf32>
    %218 = arith.subf %208, %217 : vector<8x32xf32>
    %219 = arith.mulf %218, %218 : vector<8x32xf32>
    %cst_72 = arith.constant dense<0.000000e+00> : vector<8xf32>
    %220 = vector.multi_reduction <add>, %219, %cst_72 [1] : vector<8x32xf32> to vector<8xf32>
    %221 = vector.shape_cast %220 : vector<8xf32> to vector<8x1xf32>
    %cst_73 = arith.constant 3.200000e+01 : f32
    %222 = vector.broadcast %cst_73 : f32 to vector<8x1xf32>
    %223 = arith.divf %221, %222 : vector<8x1xf32>
    %224 = vector.broadcast %216 : vector<8x1xf32> to vector<8x32xf32>
    %225 = arith.subf %208, %224 : vector<8x32xf32>
    %cst_74 = arith.constant 9.99999974E-6 : f32
    %226 = vector.broadcast %cst_74 : f32 to vector<8x1xf32>
    %227 = arith.addf %223, %226 : vector<8x1xf32>
    %228 = math.rsqrt %227 : vector<8x1xf32>
    %229 = vector.broadcast %228 : vector<8x1xf32> to vector<8x32xf32>
    %230 = arith.mulf %225, %229 : vector<8x32xf32>
    %231 = vector.shape_cast %210 : vector<32xf32> to vector<1x32xf32>
    %232 = vector.broadcast %231 : vector<1x32xf32> to vector<8x32xf32>
    %233 = arith.mulf %230, %232 : vector<8x32xf32>
    %234 = vector.shape_cast %212 : vector<32xf32> to vector<1x32xf32>
    %235 = vector.broadcast %234 : vector<1x32xf32> to vector<8x32xf32>
    %236 = arith.addf %233, %235 : vector<8x32xf32>
    %237 = arith.truncf %236 : vector<8x32xf32> to vector<8x32xbf16>
    %c0_75 = arith.constant 0 : index
    %c0_76 = arith.constant 0 : index
    %238 = vector.load %arg9[%c0_75, %c0_76] : memref<32x128xbf16, #tpu.memory_space<vmem>>, vector<32x128xbf16>
    %cst_77 = arith.constant dense<0.000000e+00> : vector<8x128xf32>
    %239 = tpu.matmul %237, %238, %cst_77 {dimension_numbers = #tpu.dot_dimension_numbers<[1], [0], [0], [1], [0, 0, 1, 1], [], []>} : vector<8x32xbf16>, vector<32x128xbf16>, vector<8x128xf32> -> vector<8x128xf32>
    %c0_78 = arith.constant 0 : index
    %c0_79 = arith.constant 0 : index
    %240 = vector.load %arg10[%c0_78, %c0_79] : memref<1x128xf32, #tpu.memory_space<vmem>>, vector<1x128xf32>
    %241 = vector.shape_cast %240 : vector<1x128xf32> to vector<128xf32>
    %242 = vector.shape_cast %241 : vector<128xf32> to vector<1x128xf32>
    %243 = vector.broadcast %242 : vector<1x128xf32> to vector<8x128xf32>
    %244 = arith.addf %239, %243 : vector<8x128xf32>
    %cst_80 = arith.constant 5.000000e-01 : f32
    %245 = vector.broadcast %cst_80 : f32 to vector<8x128xf32>
    %246 = arith.mulf %245, %244 : vector<8x128xf32>
    %cst_81 = arith.constant 2.000000e+00 : f32
    %247 = math.sqrt %cst_81 : f32
    %cst_82 = arith.constant 1.000000e+00 : f32
    %248 = arith.divf %cst_82, %247 : f32
    %249 = vector.broadcast %248 : f32 to vector<8x128xf32>
    %250 = arith.mulf %244, %249 : vector<8x128xf32>
    %251 = math.erf %250 : vector<8x128xf32>
    %cst_83 = arith.constant 1.000000e+00 : f32
    %252 = vector.broadcast %cst_83 : f32 to vector<8x128xf32>
    %253 = arith.addf %252, %251 : vector<8x128xf32>
    %254 = arith.mulf %246, %253 : vector<8x128xf32>
    %255 = arith.truncf %254 : vector<8x128xf32> to vector<8x128xbf16>
    %c0_84 = arith.constant 0 : index
    %c0_85 = arith.constant 0 : index
    %256 = vector.load %arg11[%c0_84, %c0_85] : memref<128x32xbf16, #tpu.memory_space<vmem>>, vector<128x32xbf16>
    %cst_86 = arith.constant dense<0.000000e+00> : vector<8x32xf32>
    %257 = tpu.matmul %255, %256, %cst_86 {dimension_numbers = #tpu.dot_dimension_numbers<[1], [0], [0], [1], [0, 0, 1, 1], [], []>} : vector<8x128xbf16>, vector<128x32xbf16>, vector<8x32xf32> -> vector<8x32xf32>
    %c0_87 = arith.constant 0 : index
    %c0_88 = arith.constant 0 : index
    %258 = vector.load %arg12[%c0_87, %c0_88] : memref<1x32xf32, #tpu.memory_space<vmem>>, vector<1x32xf32>
    %259 = vector.shape_cast %258 : vector<1x32xf32> to vector<32xf32>
    %260 = vector.shape_cast %259 : vector<32xf32> to vector<1x32xf32>
    %261 = vector.broadcast %260 : vector<1x32xf32> to vector<8x32xf32>
    %262 = arith.addf %257, %261 : vector<8x32xf32>
    %263 = arith.addf %208, %262 : vector<8x32xf32>
    %c0_89 = arith.constant 0 : index
    %c0_90 = arith.constant 0 : index
    %c0_91 = arith.constant 0 : index
    %264 = vector.load %arg14[%c0_89, %c0_90, %c0_91] : memref<1x8x32xf32, #tpu.memory_space<vmem>>, vector<1x8x32xf32>
    %265 = vector.shape_cast %264 : vector<1x8x32xf32> to vector<8x32xf32>
    %266 = vector.shape_cast %263 : vector<8x32xf32> to vector<1x8x32xf32>
    tpu.vector_store %arg14[%c0_89, %c0_90, %c0_91], %266 {strides = array<i32>} : memref<1x8x32xf32, #tpu.memory_space<vmem>>, vector<1x8x32xf32>,
    return
  }
  func.func @transform_0(%arg0: i32) -> (i32, i32, i32) {
    %c0_i32 = arith.constant 0 : i32
    %c0_i32_0 = arith.constant 0 : i32
    %c0_i32_1 = arith.constant 0 : i32
    return %arg0, %c0_i32, %c0_i32_0 : i32, i32, i32
  }
  func.func @transform_1(%arg0: i32) -> (i32, i32) {
    %c0_i32 = arith.constant 0 : i32
    %c0_i32_0 = arith.constant 0 : i32
    %c0_i32_1 = arith.constant 0 : i32
    return %c0_i32, %c0_i32_0 : i32, i32
  }
  func.func @transform_2(%arg0: i32) -> (i32, i32) {
    %c0_i32 = arith.constant 0 : i32
    %c0_i32_0 = arith.constant 0 : i32
    %c0_i32_1 = arith.constant 0 : i32
    return %c0_i32, %c0_i32_0 : i32, i32
  }
  func.func @transform_3(%arg0: i32) -> (i32, i32) {
    %c0_i32 = arith.constant 0 : i32
    %c0_i32_0 = arith.constant 0 : i32
    %c0_i32_1 = arith.constant 0 : i32
    return %c0_i32, %c0_i32_0 : i32, i32
  }
  func.func @transform_4(%arg0: i32) -> (i32, i32) {
    %c0_i32 = arith.constant 0 : i32
    %c0_i32_0 = arith.constant 0 : i32
    %c0_i32_1 = arith.constant 0 : i32
    return %c0_i32, %c0_i32_0 : i32, i32
  }
  func.func @transform_5(%arg0: i32) -> (i32, i32) {
    %c0_i32 = arith.constant 0 : i32
    %c0_i32_0 = arith.constant 0 : i32
    %c0_i32_1 = arith.constant 0 : i32
    return %c0_i32, %c0_i32_0 : i32, i32
  }
  func.func @transform_6(%arg0: i32) -> (i32, i32) {
    %c0_i32 = arith.constant 0 : i32
    %c0_i32_0 = arith.constant 0 : i32
    %c0_i32_1 = arith.constant 0 : i32
    return %c0_i32, %c0_i32_0 : i32, i32
  }
  func.func @transform_7(%arg0: i32) -> (i32, i32) {
    %c0_i32 = arith.constant 0 : i32
    %c0_i32_0 = arith.constant 0 : i32
    %c0_i32_1 = arith.constant 0 : i32
    return %c0_i32, %c0_i32_0 : i32, i32
  }
  func.func @transform_8(%arg0: i32) -> (i32, i32) {
    %c0_i32 = arith.constant 0 : i32
    %c0_i32_0 = arith.constant 0 : i32
    %c0_i32_1 = arith.constant 0 : i32
    return %c0_i32, %c0_i32_0 : i32, i32
  }
  func.func @transform_9(%arg0: i32) -> (i32, i32) {
    %c0_i32 = arith.constant 0 : i32
    %c0_i32_0 = arith.constant 0 : i32
    %c0_i32_1 = arith.constant 0 : i32
    return %c0_i32, %c0_i32_0 : i32, i32
  }
  func.func @transform_10(%arg0: i32) -> (i32, i32) {
    %c0_i32 = arith.constant 0 : i32
    %c0_i32_0 = arith.constant 0 : i32
    %c0_i32_1 = arith.constant 0 : i32
    return %c0_i32, %c0_i32_0 : i32, i32
  }
  func.func @transform_11(%arg0: i32) -> (i32, i32) {
    %c0_i32 = arith.constant 0 : i32
    %c0_i32_0 = arith.constant 0 : i32
    %c0_i32_1 = arith.constant 0 : i32
    return %c0_i32, %c0_i32_0 : i32, i32
  }
  func.func @transform_12(%arg0: i32) -> (i32, i32, i32) {
    %c0_i32 = arith.constant 0 : i32
    %c0_i32_0 = arith.constant 0 : i32
    %c0_i32_1 = arith.constant 0 : i32
    return %arg0, %c0_i32, %c0_i32_0 : i32, i32, i32
  }
  func.func @transform_13(%arg0: i32) -> (i32, i32, i32) {
    %c0_i32 = arith.constant 0 : i32
    %c0_i32_0 = arith.constant 0 : i32
    %c0_i32_1 = arith.constant 0 : i32
    return %arg0, %c0_i32, %c0_i32_0 : i32, i32, i32
  }
}

</mosaic_0001>

<bundles_post_ra>
// kernel: tpu_custom_call.1
= control target key start
LH: loop header
LB: loop body
LE: loop exit
PB: predicated region body
PF: predicated region fallthrough
CT: control target
= control target key end

     0   :  { %s2890_s0 = inlined_call_operand.vmem [shape: f32[2,8,32], index: 0, kind: input, shape index: {}]   ;;  %s2891_s1 = inlined_call_operand.vmem [shape: f32[1,32], index: 1, kind: input, shape index: {}]   ;;  %s2892_s2 = inlined_call_operand.vmem [shape: f32[1,32], index: 2, kind: input, shape index: {}]   ;;  %s2893_s3 = inlined_call_operand.vmem [shape: bf16[32,96], index: 3, kind: input, shape index: {}]   ;;  %s2894_s4 = inlined_call_operand.vmem [shape: bf16[32,32], index: 4, kind: input, shape index: {}]   ;;  %s2895_s5 = inlined_call_operand.vmem [shape: f32[1,32], index: 5, kind: input, shape index: {}]   ;;  %s2896_s6 = inlined_call_operand.vmem [shape: f32[1,32], index: 6, kind: input, shape index: {}]   ;;  %s2897_s7 = inlined_call_operand.vmem [shape: f32[1,32], index: 7, kind: input, shape index: {}]   ;;  %s2898_s8 = inlined_call_operand.vmem [shape: bf16[32,128], index: 8, kind: input, shape index: {}]   ;;  %s2899_s9 = inlined_call_operand.vmem [shape: f32[1,128], index: 9, kind: input, shape index: {}]   ;;  %s2900_s10 = inlined_call_operand.vmem [shape: bf16[128,32], index: 10, kind: input, shape index: {}]   ;;  %s2901_s11 = inlined_call_operand.vmem [shape: f32[1,32], index: 11, kind: input, shape index: {}]   ;;  %s2902_s12 = inlined_call_operand.hbm [shape: f32[2,1,8], index: 12, kind: output, shape index: {0}]   ;;  %s2903_s13 = inlined_call_operand.hbm [shape: f32[2,8,32], index: 13, kind: output, shape index: {1}]  }
   0x1   :  { %2905 = sst [smem:[#allocation9_spill]] %s2890_s0 }
   0x2   :  { %2906 = sst [smem:[#allocation10_spill]] %s2891_s1 }
   0x3   :  { %2907 = sst [smem:[#allocation11_spill]] %s2892_s2 }
   0x4   :  { %2908 = sst [smem:[#allocation12_spill]] %s2893_s3 }
   0x5   :  { %19 = vsyncpa [#allocation4], 0 }
   0x6   :  { %21 = vsyncpa [#allocation4 + $0x1], 0 }
   0x7   :  { %22 = vsyncpa [#allocation6], 0 }
   0x8   :  { %24 = vsyncpa [#allocation6 + $0x1], 0  ;;  %s2484_s25 = smov 0   ;;  %s2486_s26 = smov 0  }
   0x9   :  { %s2488_s27 = smov 0   ;;  %s2490_s28 = smov 0  }
   0xa LB: > { %s2505_s29 = sadd.s32 4294967295, %s2378_s28   ;;  %s1901_s30 = sadd.s32 4294967294, %s2378_s28   ;;  %s2378_s28 = sphi %s2490_s28, %s2919_s28   ;;  %s2374_s27 = sphi %s2488_s27, %s2918_s27   ;;  %s2370_s26 = sphi %s2486_s26, %s2917_s26   ;;  %s2366_s25 = sphi %s2484_s25, %s2916_s25  }
   0xb   : > { %s2509_s14 = sadd.s32 1, %s2378_s28   ;;  %s294_s15 = sadd.s32 1, %s2374_s27 }
   0xc   : > { %s291_s16 = ssub.s32 %s2378_s28, %s2509_s14  ;;  %p304_p0 = scmp.ne.s32.totalorder %s2374_s27, %s2370_s26 }
   0xd   : > { %p292_p1 = scmp.eq.s32.totalorder %s291_s16, 0  ;;  %p305_p2 = scmp.eq.s32.totalorder %s2505_s29, 1 }
   0xe   : > { %p310_p3 = scmp.ne.s32.totalorder %s2370_s26, %s2366_s25  ;;  %p311_p4 = scmp.eq.s32.totalorder %s1901_s30, 1 }
   0xf   : > { %s2520_s17 = scalar_select %p292_p1, %s2374_s27, %s294_s15  }
  0x10   : > { %p2522_p5 = por %p305_p2, %p304_p0  ;;  %p2526_p6 = por %p311_p4, %p310_p3 }
  0x11   : > { %p1904_p7 = scmp.ge.s32.totalorder %s2378_s28, 1  ;;  %p395_p8 = scmp.lt.s32.totalorder %s2378_s28, 3 }
  0x13   : > { %p396_p9 = pnand %p1904_p7, %p395_p8 }
  0x14   : > { %p442_p10 = scmp.lt.s32.totalorder (!%p396_p9), %s2505_s29, 1  ;;  %vm450_vm0 = vcmask (!%p396_p9), 261120   ;;  %s2911_s0 = sld [smem:[#allocation9_spill]] (!%p396_p9)  ;;  %v2380_v8 = vmov (!%p396_p9), 0.0   ;;  %vm2381_vm1 = vmmov (!%p396_p9), 0   ;;  %vm543_vm2 = vcmask (!%p396_p9), 31744  }
  0x15   : > { %399 = sbr.rel (%p396_p9) target bundleno = 2650 (0xa5a), region = 68  ;;  %s2912_s3 = sld [smem:[#allocation12_spill]] (!%p396_p9)  ;;  %2016 = vmatprep.subr.bf16.mxu0 (!%p396_p9), %v2380_v8  ;;  %2020 = vmatprep.mubr.msk.bf16.mxu0 (!%p396_p9), %vm2381_vm1, %v2380_v8  ;;  %vm590_vm3 = vcmask (!%p396_p9), 64512   ;;  %vm609_vm4 = vcmask (!%p396_p9), 1043456   ;;  %vm1497_vm5 = vcmask (!%p396_p9), 57344   ;;  %vm654_vm6 = vcmask (!%p396_p9), 27648  }
  0x16   : > { %2036 = vmatprep.subr.bf16.mxu1 (!%p396_p9), %v2380_v8  ;;  %2038 = vmatprep.mubr.msk.bf16.mxu1 (!%p396_p9), %vm2381_vm1, %v2380_v8  ;;  %s2913_s1 = sld [smem:[#allocation10_spill]] (!%p396_p9)  ;;  %s2914_s2 = sld [smem:[#allocation11_spill]] (!%p396_p9)  ;;  %vm774_vm7 = vcmask (!%p396_p9), 60448   ;;  %vm894_vm8 = vcmask (!%p396_p9), 93248   ;;  %vm1014_vm9 = vcmask (!%p396_p9), 126048   ;;  %vm1134_vm10 = vcmask (!%p396_p9), 158848  }
  0x17   : > { %s2382_s30 = smov (!%p396_p9), 124   ;;  %s2383_s15 = smov (!%p396_p9), 96   ;;  %vm1254_vm11 = vcmask (!%p396_p9), 191648   ;;  %vm1374_vm12 = vcmask (!%p396_p9), 224448   ;;  %vm1494_vm13 = vcmask (!%p396_p9), 257248  }
  0x18   : > { %s2384_s16 = smov (!%p396_p9), 76   ;;  %s2387_s22 = smov (!%p396_p9), 88  }
  0x19   : > { %s2388_s23 = smov (!%p396_p9), 68  }
  0x1b   : > { %v2232_v7 = vld [vmem:[%s2912_s3] sm:$0xff] (!%p396_p9)   ;;  %v2233_v9 = vld [vmem:[%s2912_s3 + $0x8] sm:$0xff] (!%p396_p9)  }
  0x1c   : > { %s443_s20 = scalar_select %p442_p10, %s2505_s29, 1  ;;  %2017 = vmatpush3.bf16.msra.mxu0 %v2232_v7  ;;  %v1907_v14 = vld [vmem:[%s2913_s1] ss:$0 sm:$0xff] }
  0x1d   : > { %2018 = vmatprep.subr.bf16.mxu0 %v2380_v8  ;;  %v1908_v16 = vld [vmem:[%s2914_s2] ss:$0 sm:$0xff]  ;;  %s2412_s1 = smov [#allocation3]  }
  0x1e   : > { %s1906_s21 = sshll.u32 %s443_s20, 3  ;;  %s2385_s20 = smov 92  }
  0x1f   : > { %s445_s24 = scalar_lea.vmem %s2911_s0, %s1906_s21  ;;  %s2386_s21 = smov 72  }
  0x20   : > { %v2537_v0 = vld [vmem:[%s445_s24] sm:$0xff]  ;;  %2019 = vmatpush3.bf16.msra.mxu0 %v2233_v9  ;;  %s2389_s24 = smov 120   ;;  %s2288_s2 = sshll.u32 %s2412_s1, 4  ;;  %s2289_s2 = int_to_ptr.vmem [resolvable:$false] %s2288_s2 }
  0x21   : > { %v451_v1 = vsel %vm450_vm0, %v2537_v0, 0.0  ;;  %2024 = vmatprep.subr.bf16.mxu0 %v2380_v8  ;;  %s2290_s3 = scalar_lea.vmem %s2289_s2, 32 }
  0x22   : > { %452 = vadd.xlane.f32.xlu0 %v451_v1 }
  0xaf   : > { %v453_v2 = vpop.xlane.xlu0 %452 }
  0xb0   : > { %v455_v3 = vmul.f32 0.03125, %v453_v2 }
  0xb2   : > { %v456_v4 = vsub.f32 %v2537_v0, %v455_v3 }
  0xb4   : > { %v457_v5 = vmul.f32 %v456_v4, %v456_v4 }
  0xb6   : > { %v458_v6 = vsel %vm450_vm0, %v457_v5, 0.0 }
  0xb7   : > { %459 = vadd.xlane.f32.xlu0 %v458_v6 }
 0x144   : > { %v460_v10 = vpop.xlane.xlu0 %459 }
 0x145   : > { %v461_v11 = vmul.f32 0.03125, %v460_v10 }
 0x147   : > { %v462_v12 = vadd.f32 1e-05, %v461_v11 }
 0x149   : > { %2246 = vrsqrt.f32 %v462_v12 }
 0x153   : > { %v2247_v13 = vpop.eup %2246 }
 0x154   : > { %v464_v15 = vmul.f32 %v2247_v13, %v456_v4 }
 0x156   : > { %v471_v17 = vmul.f32 %v1907_v14, %v464_v15 }
 0x158   : > { %v478_v18 = vadd.f32 %v1908_v16, %v471_v17 }
 0x15a   : > { %v479_v19 = vpack.c.bf16 %v478_v18, %v478_v18 }
 0x15c   : > { %2021 = vmatmul.mubr.msk.bf16.vlgmr.msra.gmra.mrb[0].mxu0 %vm450_vm0, %v479_v19 }
 0x15d   : > { %2026 = vmatprep.mubr.msk.bf16.mxu0 %vm2381_vm1, %v2380_v8 }
 0x22f   : > { %v533_v20 = vpop.f32.mrb[0].mxu0 }
 0x230   : > { %v2566_v21 = vpack.c.bf16 %v533_v20, %v533_v20  ;;  %v2022_v22 = vpop.f32.mrb[1].mxu0 }
 0x231   : > { %v536_v23 = vpop.f32.mrb[2].mxu0 }
 0x232   : > { %656 = vrot.lane.b32.xlu0 %v2566_v21, %s2382_s30  ;;  %541 = vrot.lane.b32.xlu1 %v2566_v21, %s2383_s15  ;;  %v2023_v24 = vpop.f32.mrb[3].mxu0  ;;  %s2390_s30 = smov 84   ;;  %s2391_s15 = smov 116  }
 0x236   : > { %1138 = vrot.lane.b32.xlu0 %v2566_v21, %s2384_s16  ;;  %658 = vrot.lane.b32.xlu1 %v2566_v21, %s2385_s20  ;;  %s2392_s16 = smov 80   ;;  %s2393_s20 = smov 112  }
 0x23a   : > { %1258 = vrot.lane.b32.xlu0 %v2566_v21, %s2386_s21  ;;  %778 = vrot.lane.b32.xlu1 %v2566_v21, %s2387_s22  ;;  %s2394_s21 = smov 108   ;;  %s2395_s22 = smov 104  }
 0x23e   : > { %1378 = vrot.lane.b32.xlu0 %v2566_v21, %s2388_s23  ;;  %776 = vrot.lane.b32.xlu1 %v2566_v21, %s2389_s24  ;;  %s2396_s23 = smov 100   ;;  %s2397_s24 = smov 60  }
 0x242   : > { %898 = vrot.lane.b32.xlu1 %v2566_v21, %s2390_s30  ;;  %s2398_s30 = smov 64  }
 0x246   : > { %896 = vrot.lane.b32.xlu1 %v2566_v21, %s2391_s15  ;;  %s2399_s15 = smov 56  }
 0x24a   : > { %1018 = vrot.lane.b32.xlu1 %v2566_v21, %s2392_s16  ;;  %s2400_s16 = smov 52  }
 0x24e   : > { %1016 = vrot.lane.b32.xlu1 %v2566_v21, %s2393_s20  ;;  %s2401_s20 = smov 44  }
 0x252   : > { %1136 = vrot.lane.b32.xlu1 %v2566_v21, %s2394_s21  ;;  %s2402_s21 = smov 40  }
 0x256   : > { %1256 = vrot.lane.b32.xlu1 %v2566_v21, %s2395_s22  ;;  %s2403_s22 = smov 36  }
 0x25a   : > { %1376 = vrot.lane.b32.xlu1 %v2566_v21, %s2396_s23  ;;  %s2404_s23 = smov 48  }
 0x2a4   : > { %v542_v25 = vpop.permute.xlu1 %541  ;;  %v657_v30 = vpop.permute.xlu0 %656 }
 0x2a5   : > { %v548_v26 = vsel %vm543_vm2, %v542_v25, 0 }
 0x2a6   : > { %2025 = vmatpush3.bf16.xpose.msra.mxu0 %v548_v26 }
 0x2a7   : > { %2030 = vmatprep.subr.bf16.mxu0 %v2380_v8 }
 0x2a8   : > { %v659_v27 = vpop.permute.xlu1 %658  ;;  %v1139_v38 = vpop.permute.xlu0 %1138 }
 0x2a9   : > { %v664_v28 = vsel %vm543_vm2, %v659_v27, 0  ;;  %v1144_v40 = vsel %vm543_vm2, %v1139_v38, 0 }
 0x2aa   : > { %2037 = vmatpush3.bf16.xpose.msra.mxu1 %v664_v28 }
 0x2ab   : > { %2048 = vmatprep.subr.bf16.mxu1 %v2380_v8 }
 0x2ac   : > { %v779_v29 = vpop.permute.xlu1 %778  ;;  %v1259_v41 = vpop.permute.xlu0 %1258 }
 0x2ad   : > { %2027 = vmatmul.mubr.msk.bf16.vlgmr.msra.gmra.mrb[4].mxu0 %vm543_vm2, %v2566_v21  ;;  %v784_v32 = vsel %vm543_vm2, %v779_v29, 0  ;;  %v1264_v43 = vsel %vm543_vm2, %v1259_v41, 0 }
 0x2ae   : > { %2032 = vmatprep.mubr.msk.bf16.mxu0 %vm2381_vm1, %v2380_v8 }
 0x2b0   : > { %v777_v31 = vpop.permute.xlu1 %776  ;;  %v1379_v44 = vpop.permute.xlu0 %1378 }
 0x2b1   : > { %2039 = vmatmul.mubr.msk.bf16.vlgmr.msra.gmra.mrb[0].mxu1 %vm543_vm2, %v657_v30  ;;  %v1384_v46 = vsel %vm543_vm2, %v1379_v44, 0 }
 0x2b2   : > { %2049 = vmatpush3.bf16.xpose.msra.mxu1 %v784_v32  ;;  %2050 = vmatprep.mubr.msk.bf16.mxu1 %vm2381_vm1, %v2380_v8 }
 0x2b3   : > { %2060 = vmatprep.subr.bf16.mxu1 %v2380_v8 }
 0x2b4   : > { %v899_v33 = vpop.permute.xlu1 %898 }
 0x2b5   : > { %v904_v35 = vsel %vm543_vm2, %v899_v33, 0 }
 0x2b8   : > { %v897_v34 = vpop.permute.xlu1 %896 }
 0x2b9   : > { %2051 = vmatmul.mubr.msk.bf16.vlgmr.msra.gmra.mrb[4].mxu1 %vm543_vm2, %v777_v31 }
 0x2ba   : > { %2061 = vmatpush3.bf16.xpose.msra.mxu1 %v904_v35  ;;  %2062 = vmatprep.mubr.msk.bf16.mxu1 %vm2381_vm1, %v2380_v8 }
 0x2bb   : > { %2072 = vmatprep.subr.bf16.mxu1 %v2380_v8 }
 0x2bc   : > { %v1019_v36 = vpop.permute.xlu1 %1018 }
 0x2bd   : > { %v1024_v37 = vsel %vm543_vm2, %v1019_v36, 0 }
 0x2c0   : > { %v1017_v39 = vpop.permute.xlu1 %1016 }
 0x2c1   : > { %2063 = vmatmul.mubr.msk.bf16.vlgmr.msra.gmra.mrb[8].mxu1 %vm543_vm2, %v897_v34 }
 0x2c2   : > { %2073 = vmatpush3.bf16.xpose.msra.mxu1 %v1024_v37  ;;  %2074 = vmatprep.mubr.msk.bf16.mxu1 %vm2381_vm1, %v2380_v8 }
 0x2c3   : > { %2084 = vmatprep.subr.bf16.mxu1 %v2380_v8 }
 0x2c4   : > { %v1137_v42 = vpop.permute.xlu1 %1136 }
 0x2c8   : > { %v1257_v45 = vpop.permute.xlu1 %1256 }
 0x2c9   : > { %2075 = vmatmul.mubr.msk.bf16.vlgmr.msra.gmra.mrb[12].mxu1 %vm543_vm2, %v1017_v39 }
 0x2ca   : > { %2085 = vmatpush3.bf16.xpose.msra.mxu1 %v1144_v40  ;;  %2086 = vmatprep.mubr.msk.bf16.mxu1 %vm2381_vm1, %v2380_v8 }
 0x2cb   : > { %2096 = vmatprep.subr.bf16.mxu1 %v2380_v8 }
 0x2cc   : > { %v1377_v47 = vpop.permute.xlu1 %1376 }
 0x2d1   : > { %2087 = vmatmul.mubr.msk.bf16.vlgmr.msra.gmra.mrb[16].mxu1 %vm543_vm2, %v1137_v42 }
 0x2d2   : > { %2097 = vmatpush3.bf16.xpose.msra.mxu1 %v1264_v43  ;;  %2098 = vmatprep.mubr.msk.bf16.mxu1 %vm2381_vm1, %v2380_v8 }
 0x2d3   : > { %2108 = vmatprep.subr.bf16.mxu1 %v2380_v8 }
 0x2d9   : > { %2099 = vmatmul.mubr.msk.bf16.vlgmr.msra.gmra.mrb[20].mxu1 %vm543_vm2, %v1257_v45 }
 0x2da   : > { %2109 = vmatpush3.bf16.xpose.msra.mxu1 %v1384_v46  ;;  %2110 = vmatprep.mubr.msk.bf16.mxu1 %vm2381_vm1, %v2380_v8 }
 0x2db   : > { %2120 = vmatprep.subr.bf16.mxu1 %v2380_v8 }
 0x2e1   : > { %2111 = vmatmul.mubr.msk.bf16.vlgmr.msra.gmra.mrb[24].mxu1 %vm543_vm2, %v1377_v47 }
 0x2e2   : > { %2124 = vmatprep.mubr.msk.bf16.mxu1 %vm2381_vm1, %v2380_v8 }
 0x380   : > { %v584_v48 = vpop.f32.mrb[4].mxu0 }
 0x381   : > { %v2028_v49 = vpop.f32.mrb[5].mxu0  ;;  %v591_v50 = vsel %vm590_vm3, %v584_v48, -inf }
 0x382   : > { %592 = vmax.xlane.f32.xlu0 %v591_v50  ;;  %v587_v51 = vpop.f32.mrb[6].mxu0 }
 0x383   : > { %v2029_v52 = vpop.f32.mrb[7].mxu0 }
 0x384   : > { %v700_v53 = vpop.f32.mrb[0].mxu1 }
 0x385   : > { %v2040_v54 = vpop.f32.mrb[1].mxu1  ;;  %v706_v55 = vsel %vm590_vm3, %v700_v53, -inf }
 0x386   : > { %707 = vmax.xlane.f32.xlu1 %v706_v55  ;;  %v703_v56 = vpop.f32.mrb[2].mxu1 }
 0x387   : > { %v2041_v57 = vpop.f32.mrb[3].mxu1 }
 0x38c   : > { %v820_v58 = vpop.f32.mrb[4].mxu1 }
 0x38d   : > { %v2052_v59 = vpop.f32.mrb[5].mxu1  ;;  %v826_v60 = vsel %vm590_vm3, %v820_v58, -inf }
 0x38e   : > { %v823_v61 = vpop.f32.mrb[6].mxu1  ;;  %827 = vmax.xlane.f32.xlu0 %v826_v60 }
 0x38f   : > { %v2053_v62 = vpop.f32.mrb[7].mxu1 }
 0x394   : > { %v2627_v63 = vpop.f32.mrb[8].mxu1 }
 0x395   : > { %v2064_v1 = vpop.f32.mrb[9].mxu1  ;;  %v946_v2 = vsel %vm590_vm3, %v2627_v63, -inf }
 0x396   : > { %v943_v3 = vpop.f32.mrb[10].mxu1  ;;  %947 = vmax.xlane.f32.xlu0 %v946_v2 }
 0x397   : > { %v2065_v4 = vpop.f32.mrb[11].mxu1 }
 0x39c   : > { %v2631_v5 = vpop.f32.mrb[12].mxu1 }
 0x39d   : > { %v2076_v6 = vpop.f32.mrb[13].mxu1  ;;  %v1066_v7 = vsel %vm590_vm3, %v2631_v5, -inf }
 0x39e   : > { %1067 = vmax.xlane.f32.xlu1 %v1066_v7  ;;  %v1063_v9 = vpop.f32.mrb[14].mxu1 }
 0x39f   : > { %v2077_v10 = vpop.f32.mrb[15].mxu1 }
 0x3a4   : > { %v2635_v11 = vpop.f32.mrb[16].mxu1 }
 0x3a5   : > { %v2088_v12 = vpop.f32.mrb[17].mxu1  ;;  %v1186_v13 = vsel %vm590_vm3, %v2635_v11, -inf }
 0x3a6   : > { %v1183_v14 = vpop.f32.mrb[18].mxu1  ;;  %1187 = vmax.xlane.f32.xlu0 %v1186_v13 }
 0x3a7   : > { %v2089_v15 = vpop.f32.mrb[19].mxu1 }
 0x3ac   : > { %v1300_v16 = vpop.f32.mrb[20].mxu1 }
 0x3ad   : > { %v2100_v17 = vpop.f32.mrb[21].mxu1  ;;  %v1306_v18 = vsel %vm590_vm3, %v1300_v16, -inf }
 0x3ae   : > { %1307 = vmax.xlane.f32.xlu1 %v1306_v18  ;;  %v1303_v19 = vpop.f32.mrb[22].mxu1 }
 0x3af   : > { %v2101_v20 = vpop.f32.mrb[23].mxu1 }
 0x3b4   : > { %v2640_v22 = vpop.f32.mrb[24].mxu1 }
 0x3b5   : > { %v2112_v23 = vpop.f32.mrb[25].mxu1  ;;  %v1426_v26 = vsel %vm590_vm3, %v2640_v22, -inf }
 0x3b6   : > { %v1423_v24 = vpop.f32.mrb[26].mxu1 }
 0x3b7   : > { %v2113_v25 = vpop.f32.mrb[27].mxu1 }
 0x3bc   : > { %719 = vrot.lane.b32.xlu0 %v2566_v21, %s2397_s24  ;;  %s2724_s24 = sand.u32 1, %s2370_s26  }
 0x3bf   : > { %604 = vrot.lane.b32.xlu1 %v2566_v21, %s2398_s30  ;;  %s2904_s30 = scalar_lea.vmem [#allocation3], %s2724_s24 }
 0x3db   : > { %1427 = vmax.xlane.f32.xlu0 %v1426_v26 }
 0x40f   : > { %v593_v27 = vpop.xlane.xlu0 %592 }
 0x410   : > { %v594_v28 = vsub.f32 %v584_v48, %v593_v27 }
 0x412   : > { %v595_v29 = vmul.f32 1.442695, %v594_v28 }
 0x413   : > { %v708_v30 = vpop.xlane.xlu1 %707 }
 0x414   : > { %2248 = vpow2.f32 %v595_v29  ;;  %v709_v31 = vsub.f32 %v700_v53, %v708_v30 }
 0x416   : > { %v710_v32 = vmul.f32 1.442695, %v709_v31 }
 0x418   : > { %2250 = vpow2.f32 %v710_v32 }
 0x41b   : > { %v828_v33 = vpop.xlane.xlu0 %827 }
 0x41c   : > { %v829_v34 = vsub.f32 %v820_v58, %v828_v33 }
 0x41e   : > { %v2646_v35 = vpop.eup %2248  ;;  %v830_v36 = vmul.f32 1.442695, %v829_v34 }
 0x41f   : > { %v597_v37 = vsel %vm590_vm3, %v2646_v35, 0.0 }
 0x420   : > { %2252 = vpow2.f32 %v830_v36  ;;  %598 = vadd.xlane.f32.xlu1 %v597_v37 }
 0x422   : > { %v2650_v38 = vpop.eup %2250 }
 0x423   : > { %v712_v39 = vsel %vm590_vm3, %v2650_v38, 0.0  ;;  %v948_v45 = vpop.xlane.xlu0 %947 }
 0x424   : > { %713 = vadd.xlane.f32.xlu0 %v712_v39  ;;  %v949_v47 = vsub.f32 %v2627_v63, %v948_v45 }
 0x426   : > { %v950_v48 = vmul.f32 1.442695, %v949_v47 }
 0x428   : > { %2254 = vpow2.f32 %v950_v48 }
 0x42a   : > { %v2654_v40 = vpop.eup %2252 }
 0x42b   : > { %v832_v41 = vsel %vm590_vm3, %v2654_v40, 0.0  ;;  %v1068_v42 = vpop.xlane.xlu1 %1067 }
 0x42c   : > { %833 = vadd.xlane.f32.xlu1 %v832_v41  ;;  %v1069_v49 = vsub.f32 %v2631_v5, %v1068_v42 }
 0x42e   : > { %v1070_v52 = vmul.f32 1.442695, %v1069_v49 }
 0x430   : > { %2256 = vpow2.f32 %v1070_v52 }
 0x432   : > { %v2665_v56 = vpop.eup %2254 }
 0x433   : > { %v1188_v50 = vpop.xlane.xlu0 %1187  ;;  %v952_v57 = vsel %vm590_vm3, %v2665_v56, 0.0 }
 0x434   : > { %v1189_v51 = vsub.f32 %v2635_v11, %v1188_v50 }
 0x436   : > { %v1190_v54 = vmul.f32 1.442695, %v1189_v51 }
 0x437   : > { %v720_v1 = vpop.permute.xlu0 %719 }
 0x438   : > { %2258 = vpow2.f32 %v1190_v54  ;;  %v725_v15 = vsel %vm609_vm4, %v720_v1, 0 }
 0x43a   : > { %839 = vrot.lane.b32.xlu0 %v2566_v21, %s2399_s15  ;;  %v2669_v58 = vpop.eup %2256  ;;  %s2405_s15 = smov 4  }
 0x43b   : > { %v1308_v43 = vpop.xlane.xlu1 %1307  ;;  %v1072_v60 = vsel %vm590_vm3, %v2669_v58, 0.0 }
 0x43c   : > { %v1309_v53 = vsub.f32 %v1300_v16, %v1308_v43 }
 0x43d   : > { %959 = vrot.lane.b32.xlu1 %v2566_v21, %s2400_s16  ;;  %s2406_s16 = smov 8  }
 0x43e   : > { %v1310_v55 = vmul.f32 1.442695, %v1309_v53 }
 0x43f   : > { %v605_v44 = vpop.permute.xlu1 %604 }
 0x440   : > { %v611_v46 = vsel %vm609_vm4, %v605_v44, 0  ;;  %2260 = vpow2.f32 %v1310_v55 }
 0x441   : > { %2031 = vmatpush3.bf16.msra.mxu0 %v611_v46 }
 0x442   : > { %2042 = vmatprep.subr.bf16.mxu0 %v2380_v8  ;;  %v2671_v59 = vpop.eup %2258 }
 0x443   : > { %v1192_v63 = vsel %vm590_vm3, %v2671_v59, 0.0 }
 0x44a   : > { %v2675_v61 = vpop.eup %2260 }
 0x44b   : > { %v1312_v62 = vsel %vm590_vm3, %v2675_v61, 0.0 }
 0x459   : > { %953 = vadd.xlane.f32.xlu0 %v952_v57 }
 0x45d   : > { %1073 = vadd.xlane.f32.xlu0 %v1072_v60 }
 0x461   : > { %1313 = vadd.xlane.f32.xlu0 %v1312_v62  ;;  %1193 = vadd.xlane.f32.xlu1 %v1192_v63 }
 0x468   : > { %v1428_v2 = vpop.xlane.xlu0 %1427 }
 0x469   : > { %v1429_v3 = vsub.f32 %v2640_v22, %v1428_v2 }
 0x46b   : > { %v1430_v4 = vmul.f32 1.442695, %v1429_v3 }
 0x46d   : > { %2262 = vpow2.f32 %v1430_v4 }
 0x472   : > { %1199 = vrot.lane.b32.xlu1 %v2566_v21, %s2401_s20  ;;  %s2407_s20 = smov 12  }
 0x476   : > { %1319 = vrot.lane.b32.xlu1 %v2566_v21, %s2402_s21  ;;  %s2408_s21 = smov 16  }
 0x477   : > { %v2684_v5 = vpop.eup %2262 }
 0x478   : > { %v1432_v6 = vsel %vm590_vm3, %v2684_v5, 0.0 }
 0x479   : > { %1433 = vadd.xlane.f32.xlu0 %v1432_v6 }
 0x47a   : > { %1439 = vrot.lane.b32.xlu1 %v2566_v21, %s2403_s22  ;;  %s2409_s22 = smov 20  }
 0x48f   : > { %1079 = vrot.lane.b32.xlu0 %v2566_v21, %s2404_s23  ;;  %s2915_s23 = scalar_lea.vmem [#allocation3], %s2724_s24 }
 0x4ad   : > { %v599_v7 = vpop.xlane.xlu1 %598 }
 0x4ae   : > { %2264 = vrcp.f32 %v599_v7 }
 0x4b1   : > { %v714_v9 = vpop.xlane.xlu0 %713 }
 0x4b2   : > { %2266 = vrcp.f32 %v714_v9 }
 0x4b5   : > { %v840_v17 = vpop.permute.xlu0 %839 }
 0x4b6   : > { %v845_v20 = vsel %vm609_vm4, %v840_v17, 0 }
 0x4b8   : > { %v2265_v10 = vpop.eup %2264 }
 0x4b9   : > { %v601_v11 = vmul.f32 %v2265_v10, %v2646_v35  ;;  %v834_v12 = vpop.xlane.xlu1 %833 }
 0x4ba   : > { %2268 = vrcp.f32 %v834_v12 }
 0x4bb   : > { %v603_v13 = vpack.c.bf16 %v601_v11, %v601_v11 }
 0x4bc   : > { %v2267_v14 = vpop.eup %2266 }
 0x4bd   : > { %v716_v16 = vmul.f32 %v2267_v14, %v2650_v38  ;;  %2033 = vmatmul.mubr.msk.bf16.vlgmr.msra.gmra.mrb[8].mxu0 %vm590_vm3, %v603_v13  ;;  %v960_v24 = vpop.permute.xlu1 %959 }
 0x4be   : > { %2043 = vmatpush3.bf16.msra.mxu0 %v725_v15  ;;  %2044 = vmatprep.mubr.msk.bf16.mxu0 %vm2381_vm1, %v2380_v8  ;;  %v965_v26 = vsel %vm609_vm4, %v960_v24, 0 }
 0x4bf   : > { %v717_v21 = vadd.f32 %v716_v16, %v601_v11  ;;  %2054 = vmatprep.subr.bf16.mxu0 %v2380_v8  ;;  %v718_v18 = vpack.c.bf16 %v716_v16, %v716_v16 }
 0x4c4   : > { %v2269_v19 = vpop.eup %2268 }
 0x4c5   : > { %v836_v22 = vmul.f32 %v2269_v19, %v2654_v40  ;;  %2045 = vmatmul.mubr.msk.bf16.vlgmr.msra.gmra.mrb[12].mxu0 %vm590_vm3, %v718_v18 }
 0x4c6   : > { %2055 = vmatpush3.bf16.msra.mxu0 %v845_v20  ;;  %2056 = vmatprep.mubr.msk.bf16.mxu0 %vm2381_vm1, %v2380_v8 }
 0x4c7   : > { %v837_v23 = vadd.f32 %v836_v22, %v717_v21  ;;  %2066 = vmatprep.subr.bf16.mxu0 %v2380_v8  ;;  %v838_v25 = vpack.c.bf16 %v836_v22, %v836_v22 }
 0x4cd   : > { %2057 = vmatmul.mubr.msk.bf16.vlgmr.msra.gmra.mrb[16].mxu0 %vm590_vm3, %v838_v25 }
 0x4ce   : > { %2067 = vmatpush3.bf16.msra.mxu0 %v965_v26  ;;  %2068 = vmatprep.mubr.msk.bf16.mxu0 %vm2381_vm1, %v2380_v8 }
 0x4cf   : > { %2078 = vmatprep.subr.bf16.mxu0 %v2380_v8 }
 0x4e6   : > { %v954_v27 = vpop.xlane.xlu0 %953 }
 0x4e7   : > { %2270 = vrcp.f32 %v954_v27 }
 0x4ea   : > { %v1074_v31 = vpop.xlane.xlu0 %1073 }
 0x4eb   : > { %2272 = vrcp.f32 %v1074_v31  ;;  %v2235_v31 = vld [vmem:[%s2894_s4 + $0x8] sm:$0xff]  }
 0x4ee   : > { %v1194_v32 = vpop.xlane.xlu1 %1193  ;;  %v1314_v33 = vpop.xlane.xlu0 %1313 }
 0x4ef   : > { %2274 = vrcp.f32 %v1194_v32 }
 0x4f0   : > { %2276 = vrcp.f32 %v1314_v33 }
 0x4f1   : > { %v2271_v28 = vpop.eup %2270 }
 0x4f2   : > { %v956_v29 = vmul.f32 %v2271_v28, %v2665_v56  ;;  %v1200_v43 = vpop.permute.xlu1 %1199 }
 0x4f3   : > { %v1205_v47 = vsel %vm609_vm4, %v1200_v43, 0 }
 0x4f4   : > { %v958_v30 = vpack.c.bf16 %v956_v29, %v956_v29  ;;  %v957_v38 = vadd.f32 %v956_v29, %v837_v23  ;;  %v2234_v29 = vld [vmem:[%s2894_s4] sm:$0xff]  }
 0x4f5   : > { %v2273_v34 = vpop.eup %2272  ;;  %2121 = vmatpush3.bf16.msra.mxu1 %v2234_v29 }
 0x4f6   : > { %2069 = vmatmul.mubr.msk.bf16.vlgmr.msra.gmra.mrb[20].mxu0 %vm590_vm3, %v958_v30  ;;  %v1076_v37 = vmul.f32 %v2273_v34, %v2669_v58  ;;  %v1320_v52 = vpop.permute.xlu1 %1319  ;;  %2122 = vmatprep.subr.bf16.mxu1 %v2380_v8 }
 0x4f7   : > { %2080 = vmatprep.mubr.msk.bf16.mxu0 %vm2381_vm1, %v2380_v8  ;;  %v1325_v56 = vsel %vm609_vm4, %v1320_v52, 0 }
 0x4f8   : > { %v1077_v42 = vadd.f32 %v1076_v37, %v957_v38  ;;  %v1078_v45 = vpack.c.bf16 %v1076_v37, %v1076_v37 }
 0x4f9   : > { %v2275_v36 = vpop.eup %2274  ;;  %2123 = vmatpush3.bf16.msra.mxu1 %v2235_v31 }
 0x4fa   : > { %v1196_v39 = vmul.f32 %v2275_v36, %v2671_v59  ;;  %v2277_v44 = vpop.eup %2276  ;;  %v1440_v57 = vpop.permute.xlu1 %1439  ;;  %2136 = vmatprep.subr.bf16.mxu1 %v2380_v8 }
 0x4fb   : > { %v1316_v48 = vmul.f32 %v2277_v44, %v2675_v61  ;;  %v1445_v59 = vsel %vm609_vm4, %v1440_v57, 0 }
 0x4fc   : > { %v1197_v46 = vadd.f32 %v1196_v39, %v1077_v42  ;;  %v1198_v54 = vpack.c.bf16 %v1196_v39, %v1196_v39 }
 0x4fd   : > { %v1318_v58 = vpack.c.bf16 %v1316_v48, %v1316_v48 }
 0x4fe   : > { %v1317_v51 = vadd.f32 %v1316_v48, %v1197_v46 }
 0x506   : > { %v1434_v35 = vpop.xlane.xlu0 %1433 }
 0x507   : > { %2278 = vrcp.f32 %v1434_v35 }
 0x50a   : > { %v1080_v40 = vpop.permute.xlu0 %1079 }
 0x50b   : > { %v1085_v41 = vsel %vm609_vm4, %v1080_v40, 0 }
 0x50c   : > { %2079 = vmatpush3.bf16.msra.mxu0 %v1085_v41 }
 0x50d   : > { %2090 = vmatprep.subr.bf16.mxu0 %v2380_v8 }
 0x50f   : > { %2081 = vmatmul.mubr.msk.bf16.vlgmr.msra.gmra.mrb[24].mxu0 %vm590_vm3, %v1078_v45 }
 0x510   : > { %2091 = vmatpush3.bf16.msra.mxu0 %v1205_v47  ;;  %2092 = vmatprep.mubr.msk.bf16.mxu0 %vm2381_vm1, %v2380_v8 }
 0x511   : > { %v2279_v49 = vpop.eup %2278  ;;  %2102 = vmatprep.subr.bf16.mxu0 %v2380_v8 }
 0x512   : > { %v1436_v50 = vmul.f32 %v2279_v49, %v2684_v5 }
 0x514   : > { %v1437_v53 = vadd.f32 %v1436_v50, %v1317_v51  ;;  %v1438_v60 = vpack.c.bf16 %v1436_v50, %v1436_v50  ;;  %v1938_v50 = vld [vmem:[%s2895_s5] ss:$0 sm:$0xff] }
 0x516   : > { %v1496_v55 = vmul.f32 0.125, %v1437_v53 }
 0x517   : > { %2093 = vmatmul.mubr.msk.bf16.vlgmr.msra.gmra.mrb[28].mxu0 %vm590_vm3, %v1198_v54 }
 0x518   : > { %2103 = vmatpush3.bf16.msra.mxu0 %v1325_v56  ;;  %2104 = vmatprep.mubr.msk.bf16.mxu0 %vm2381_vm1, %v2380_v8  ;;  %1498 = vst.msk [vmem:[%s2904_s30] sm:$0x1] %vm1497_vm5, %v1496_v55 }
 0x519   : > { %2114 = vmatprep.subr.bf16.mxu0 %v2380_v8 }
 0x51f   : > { %2105 = vmatmul.mubr.msk.bf16.vlgmr.msra.gmra.mrb[32].mxu0 %vm590_vm3, %v1318_v58 }
 0x520   : > { %2115 = vmatpush3.bf16.msra.mxu0 %v1445_v59  ;;  %2116 = vmatprep.mubr.msk.bf16.mxu0 %vm2381_vm1, %v2380_v8 }
 0x521   : > { %2128 = vmatprep.subr.bf16.mxu0 %v2380_v8 }
 0x527   : > { %2117 = vmatmul.mubr.msk.bf16.vlgmr.msra.gmra.mrb[36].mxu0 %vm590_vm3, %v1438_v60 }
 0x528   : > { %2132 = vmatprep.mubr.msk.bf16.mxu0 %vm2381_vm1, %v2380_v8 }
 0x590   : > { %v647_v61 = vpop.f32.mrb[8].mxu0 }
 0x591   : > { %v653_v62 = vpack.c.bf16 %v647_v61, %v647_v61  ;;  %v2034_v63 = vpop.f32.mrb[9].mxu0 }
 0x592   : > { %v650_v1 = vpop.f32.mrb[10].mxu0  ;;  %v2238_v63 = vld [vmem:[%s2900_s10] sm:$0xff]  }
 0x593   : > { %655 = vst.msk [vmem:[#allocation2] sm:$0xf] %vm654_vm6, %v653_v62  ;;  %v2035_v2 = vpop.f32.mrb[11].mxu0  ;;  %v2237_v62 = vld [vmem:[%s2898_s8 + $0x8] sm:$0xff]  }
 0x594   : > { %v2239_v1 = vld [vmem:[%s2900_s10 + $0x8] sm:$0xff]   ;;  %v2240_v2 = vld [vmem:[%s2900_s10 + $0x10] sm:$0xff]  }
 0x598   : > { %v761_v3 = vpop.f32.mrb[12].mxu0 }
 0x599   : > { %v1959_v4 = vpack.c.bf16 %v761_v3, %v761_v3  ;;  %v2046_v5 = vpop.f32.mrb[13].mxu0 }
 0x59a   : > { %v764_v6 = vpop.f32.mrb[14].mxu0 }
 0x59b   : > { %771 = vrot.lane.b32.xlu1 %v1959_v4, %s2405_s15  ;;  %v2047_v7 = vpop.f32.mrb[15].mxu0  ;;  %s1801_s15 = sshll.u32 %s2915_s23, 4  ;;  %s1802_s15 = int_to_ptr.vmem [resolvable:$true] %s1801_s15 }
 0x59c   : > { %v1939_v7 = vld [vmem:[%s2896_s6] ss:$0 sm:$0xff]  ;;  %p2291_p0 = scmp.lt.s32.totalorder %s1802_s15, %s2289_s2 }
 0x5a0   : > { %v881_v9 = vpop.f32.mrb[16].mxu0 }
 0x5a1   : > { %v1960_v10 = vpack.c.bf16 %v881_v9, %v881_v9  ;;  %v2058_v11 = vpop.f32.mrb[17].mxu0 }
 0x5a2   : > { %v884_v12 = vpop.f32.mrb[18].mxu0 }
 0x5a3   : > { %891 = vrot.lane.b32.xlu1 %v1960_v10, %s2406_s16  ;;  %v2059_v13 = vpop.f32.mrb[19].mxu0  ;;  %v1940_v10 = vld [vmem:[%s2897_s7] ss:$0 sm:$0xff]  ;;  %s1784_s16 = scalar_lea.sflag [#allocation4], %s2724_s24 }
 0x5c9   : > { %v1001_v14 = vpop.f32.mrb[20].mxu0 }
 0x5ca   : > { %v1961_v15 = vpack.c.bf16 %v1001_v14, %v1001_v14  ;;  %v2070_v16 = vpop.f32.mrb[21].mxu0  ;;  %v2241_v14 = vld [vmem:[%s2900_s10 + $0x18] sm:$0xff]  }
 0x5cb   : > { %v1004_v21 = vpop.f32.mrb[22].mxu0  ;;  %v2243_v16 = vld [vmem:[%s2900_s10 + $0x28] sm:$0xff]  }
 0x5cc   : > { %1011 = vrot.lane.b32.xlu0 %v1961_v15, %s2407_s20  ;;  %v2071_v17 = vpop.f32.mrb[23].mxu0  ;;  %v2242_v15 = vld [vmem:[%s2900_s10 + $0x20] sm:$0xff]   ;;  %v2244_v21 = vld [vmem:[%s2900_s10 + $0x30] sm:$0xff]   ;;  %s2284_s20 = scalar_lea.vmem %s1802_s15, 16 }
 0x5cd   : > { %v2245_v17 = vld [vmem:[%s2900_s10 + $0x38] sm:$0xff]   ;;  %p2285_p11 = scmp.ne.s32.totalorder %s1802_s15, %s2284_s20  ;;  %p2292_p1 = scmp.lt.s32.totalorder %s2290_s3, %s2284_s20 }
 0x5cf   : > { %p2286_p12 = pnand %p2285_p11, %p2522_p5  ;;  %p2293_p2 = por %p2292_p1, %p2291_p0 }
 0x5d1   : > { %p2287_p13 = pneg %p2286_p12 }
 0x5d3   : > { %p2294_p3 = pnand %p2293_p2, %p2287_p13 }
 0x5e2   : > { %v1121_v18 = vpop.f32.mrb[24].mxu0 }
 0x5e3   : > { %v1962_v19 = vpack.c.bf16 %v1121_v18, %v1121_v18  ;;  %v2082_v20 = vpop.f32.mrb[25].mxu0  ;;  %v1941_v18 = vld [vmem:[%s2899_s9] ss:$0 sm:$0xff] }
 0x5e4   : > { %v1124_v22 = vpop.f32.mrb[26].mxu0 }
 0x5e5   : > { %1131 = vrot.lane.b32.xlu1 %v1962_v19, %s2408_s21  ;;  %v2083_v23 = vpop.f32.mrb[27].mxu0  ;;  %s2410_s21 = smov 24  }
 0x5ea   : > { %v1241_v24 = vpop.f32.mrb[28].mxu0 }
 0x5eb   : > { %v1963_v25 = vpack.c.bf16 %v1241_v24, %v1241_v24  ;;  %v2094_v26 = vpop.f32.mrb[29].mxu0 }
 0x5ec   : > { %v1244_v27 = vpop.f32.mrb[30].mxu0 }
 0x5ed   : > { %1251 = vrot.lane.b32.xlu0 %v1963_v25, %s2409_s22  ;;  %v2095_v28 = vpop.f32.mrb[31].mxu0  ;;  %s2411_s22 = smov 28  }
 0x5f2   : > { %v1361_v30 = vpop.f32.mrb[32].mxu0 }
 0x5f3   : > { %v1964_v32 = vpack.c.bf16 %v1361_v30, %v1361_v30  ;;  %v2106_v33 = vpop.f32.mrb[33].mxu0 }
 0x5f4   : > { %v1364_v34 = vpop.f32.mrb[34].mxu0 }
 0x5f5   : > { %1371 = vrot.lane.b32.xlu1 %v1964_v32, %s2410_s21  ;;  %v2107_v35 = vpop.f32.mrb[35].mxu0  ;;  %s1955_s21 = sshll.u32 %s2505_s29, 4 }
 0x5fa   : > { %v1481_v36 = vpop.f32.mrb[36].mxu0 }
 0x5fb   : > { %v1965_v37 = vpack.c.bf16 %v1481_v36, %v1481_v36  ;;  %v2118_v38 = vpop.f32.mrb[37].mxu0 }
 0x5fc   : > { %v1484_v39 = vpop.f32.mrb[38].mxu0 }
 0x5fd   : > { %1491 = vrot.lane.b32.xlu0 %v1965_v37, %s2411_s22  ;;  %v2119_v40 = vpop.f32.mrb[39].mxu0  ;;  %s2815_s22 = scalar_lea.hbm %s2902_s12, %s1955_s21 }
 0x60d   : > { %v772_v41 = vpop.permute.xlu1 %771 }
 0x60e   : > { %775 = vst.msk [vmem:[#allocation2] sm:$0xf] %vm774_vm7, %v772_v41 }
 0x615   : > { %v892_v42 = vpop.permute.xlu1 %891 }
 0x616   : > { %895 = vst.msk [vmem:[#allocation2] sm:$0xf] %vm894_vm8, %v892_v42 }
 0x63e   : > { %v1012_v43 = vpop.permute.xlu0 %1011 }
 0x63f   : > { %1015 = vst.msk [vmem:[#allocation2] sm:$0xf] %vm1014_vm9, %v1012_v43 }
 0x657   : > { %v1132_v44 = vpop.permute.xlu1 %1131 }
 0x658   : > { %1135 = vst.msk [vmem:[#allocation2] sm:$0xf] %vm1134_vm10, %v1132_v44 }
 0x65f   : > { %v1252_v45 = vpop.permute.xlu0 %1251 }
 0x660   : > { %1255 = vst.msk [vmem:[#allocation2] sm:$0xf] %vm1254_vm11, %v1252_v45 }
 0x667   : > { %v1372_v46 = vpop.permute.xlu1 %1371 }
 0x668   : > { %1375 = vst.msk [vmem:[#allocation2] sm:$0xf] %vm1374_vm12, %v1372_v46 }
 0x66f   : > { %v1492_v47 = vpop.permute.xlu0 %1491 }
 0x670   : > { %1495 = vst.msk [vmem:[#allocation2] sm:$0xf] %vm1494_vm13, %v1492_v47 }
 0x677   : > { %v1499_v48 = vld [vmem:[#allocation2] sm:$0xf] }
 0x678   : > { %2125 = vmatmul.mubr.msk.bf16.vlgmr.msra.gmra.mrb[28].mxu1 %vm450_vm0, %v1499_v48 }
 0x679   : > { %2152 = vmatprep.mubr.msk.bf16.mxu1 %vm2381_vm1, %v2380_v8  ;;  %2137 = vmatpush3.bf16.msra.mxu1 %v2238_v63 }
 0x67a   : > { %2138 = vmatprep.subr.bf16.mxu1 %v2380_v8 }
 0x67d   : > { %2139 = vmatpush3.bf16.msra.mxu1 %v2239_v1 }
 0x67e   : > { %2140 = vmatprep.subr.bf16.mxu1 %v2380_v8 }
 0x681   : > { %2141 = vmatpush3.bf16.msra.mxu1 %v2240_v2 }
 0x682   : > { %2142 = vmatprep.subr.bf16.mxu1 %v2380_v8 }
 0x685   : > { %2143 = vmatpush3.bf16.msra.mxu1 %v2241_v14 }
 0x686   : > { %2144 = vmatprep.subr.bf16.mxu1 %v2380_v8 }
 0x689   : > { %2145 = vmatpush3.bf16.msra.mxu1 %v2242_v15 }
 0x68a   : > { %2146 = vmatprep.subr.bf16.mxu1 %v2380_v8 }
 0x68d   : > { %2147 = vmatpush3.bf16.msra.mxu1 %v2243_v16 }
 0x68e   : > { %2148 = vmatprep.subr.bf16.mxu1 %v2380_v8 }
 0x691   : > { %2149 = vmatpush3.bf16.msra.mxu1 %v2244_v21 }
 0x692   : > { %2150 = vmatprep.subr.bf16.mxu1 %v2380_v8 }
 0x695   : > { %2151 = vmatpush3.bf16.msra.mxu1 %v2245_v17 }
 0x74b   : > { %v1553_v49 = vpop.f32.mrb[28].mxu1 }
 0x74c   : > { %v1559_v51 = vadd.f32 %v1553_v49, %v2537_v0  ;;  %v2126_v52 = vpop.f32.mrb[29].mxu1  ;;  %v2236_v0 = vld [vmem:[%s2898_s8] sm:$0xff]  }
 0x74d   : > { %v1556_v53 = vpop.f32.mrb[30].mxu1  ;;  %2129 = vmatpush3.bf16.msra.mxu0 %v2236_v0 }
 0x74e   : > { %v2757_v54 = vadd.f32 %v1938_v50, %v1559_v51  ;;  %v2127_v55 = vpop.f32.mrb[31].mxu1  ;;  %2130 = vmatprep.subr.bf16.mxu0 %v2380_v8 }
 0x750   : > { %v1570_v56 = vsel %vm450_vm0, %v2757_v54, 0.0 }
 0x751   : > { %1571 = vadd.xlane.f32.xlu1 %v1570_v56  ;;  %2131 = vmatpush3.bf16.msra.mxu0 %v2237_v62 }
 0x7de   : > { %v1572_v57 = vpop.xlane.xlu1 %1571 }
 0x7df   : > { %v1573_v58 = vmul.f32 0.03125, %v1572_v57 }
 0x7e1   : > { %v1574_v59 = vsub.f32 %v2757_v54, %v1573_v58 }
 0x7e3   : > { %v1575_v60 = vmul.f32 %v1574_v59, %v1574_v59 }
 0x7e5   : > { %v1576_v61 = vsel %vm450_vm0, %v1575_v60, 0.0 }
 0x7e6   : > { %1577 = vadd.xlane.f32.xlu0 %v1576_v61 }
 0x873   : > { %v1578_v3 = vpop.xlane.xlu0 %1577 }
 0x874   : > { %v1579_v4 = vmul.f32 0.03125, %v1578_v3 }
 0x876   : > { %v1580_v5 = vadd.f32 1e-05, %v1579_v4 }
 0x878   : > { %2280 = vrsqrt.f32 %v1580_v5 }
 0x882   : > { %v2281_v6 = vpop.eup %2280 }
 0x883   : > { %v1582_v9 = vmul.f32 %v2281_v6, %v1574_v59 }
 0x885   : > { %v1589_v11 = vmul.f32 %v1939_v7, %v1582_v9 }
 0x887   : > { %v1596_v12 = vadd.f32 %v1940_v10, %v1589_v11 }
 0x889   : > { %v1597_v13 = vpack.c.bf16 %v1596_v12, %v1596_v12 }
 0x88b   : > { %2133 = vmatmul.mubr.msk.bf16.vlgmr.msra.gmra.mrb[40].mxu0 %vm450_vm0, %v1597_v13 }
 0x95e   : > { %v1658_v19 = vpop.f32.mrb[40].mxu0 }
 0x95f   : > { %v1659_v20 = vadd.f32 %v1941_v18, %v1658_v19  ;;  %v2134_v22 = vpop.f32.mrb[41].mxu0 }
 0x960   : > { %v1661_v23 = vpop.f32.mrb[42].mxu0 }
 0x961   : > { %v1665_v24 = vmul.f32 0.70710677, %v1659_v20  ;;  %v2135_v25 = vpop.f32.mrb[43].mxu0  ;;  %v1664_v26 = vmul.f32 0.5, %v1659_v20 }
 0x963   : > { %2282 = verf.f32 %v1665_v24 }
 0x96d   : > { %v2283_v8 = vpop.eup %2282 }
 0x96e   : > { %v1667_v27 = vadd.f32 1.0, %v2283_v8 }
 0x970   : > { %v1668_v28 = vmul.f32 %v1667_v27, %v1664_v26 }
 0x972   : > { %v1669_v29 = vpack.c.bf16 %v1668_v28, %v1668_v28 }
 0x974   : > { %2153 = vmatmul.mubr.bf16.vlgmr.msra.gmra.mrb[32].mxu1 %v1669_v29 }
 0x975   : > { %2297 = shalt.err (!%p2294_p3)
}
 0x976   : > { %s2298_s21 = scalar_lea.hbm %s2815_s22, 16  ;;  %s2302_s1 = scalar_lea.hbm %s2902_s12, 32 }
 0x977   : > { %p2299_p4 = scmp.ne.s32.totalorder %s2815_s22, %s2298_s21  ;;  %p2303_p9 = scmp.lt.u32.totalorder %s2815_s22, %s2902_s12 }
 0x978   : > { %p2304_p10 = scmp.lt.u32.totalorder %s2302_s1, %s2298_s21  ;;  %p2306_p12 = scmp.lt.u32.totalorder %s2298_s21, %s2815_s22 }
 0x979   : > { %p2300_p7 = pnand %p2299_p4, %p2522_p5 }
 0x97a   : > { %p2305_p11 = por %p2304_p10, %p2303_p9 }
 0x97b   : > { %p2301_p8 = pneg %p2300_p7 }
 0x97c   : > { %p2307_p13 = por %p2306_p12, %p2305_p11 }
 0x97e   : > { %p2308_p0 = pnand %p2307_p13, %p2301_p8 }
 0x980   : > { %2311 = shalt.err (!%p2308_p0)
}
 0x981   : > { %2156 = dma.vmem_to_hbm [thread:$0]  (%p2522_p5), %s1802_s15, 16, %s2815_s22, %s1784_s16   ;;  %v1945_v30 = vld [vmem:[%s2901_s11] ss:$0 sm:$0xff] }
 0x982   : > { %s1905_s3 = sshll.u32 %s2724_s24, 3  ;;  %s1956_s30 = sshll.u32 %s2505_s29, 7 }
 0x983   : > { %s441_s1 = scalar_lea.vmem [#allocation5], %s1905_s3  ;;  %s2846_s22 = scalar_lea.hbm %s2903_s13, %s1956_s30 }
 0x984   : > { %s1814_s21 = sshll.u32 %s441_s1, 4  ;;  %s1788_s29 = scalar_lea.sflag [#allocation6], %s2724_s24  ;;  %s2848_s21 = int_to_ptr.vmem [resolvable:$true] %s1814_s21 }
 0x985   : > { %s2312_s15 = scalar_lea.vmem %s2848_s21, 128  ;;  %s2413_s16 = smov [#allocation5]  }
 0x986   : > { %p2313_p1 = scmp.ne.s32.totalorder %s2848_s21, %s2312_s15  ;;  %s2316_s3 = sshll.u32 %s2413_s16, 4  ;;  %s2317_s3 = int_to_ptr.vmem [resolvable:$false] %s2316_s3 }
 0x987   : > { %s2318_s20 = scalar_lea.vmem %s2317_s3, 256  ;;  %p2319_p4 = scmp.lt.s32.totalorder %s2848_s21, %s2317_s3 }
 0x988   : > { %p2314_p2 = pnand %p2313_p1, %p2522_p5  ;;  %p2320_p7 = scmp.lt.s32.totalorder %s2318_s20, %s2312_s15 }
 0x98a   : > { %p2315_p3 = pneg %p2314_p2  ;;  %p2321_p8 = por %p2320_p7, %p2319_p4 }
 0x98c   : > { %p2322_p9 = pnand %p2321_p8, %p2315_p3 }
 0xa47   : > { %v1775_v31 = vpop.f32.mrb[32].mxu1 }
 0xa48   : > { %v1776_v32 = vadd.f32 %v1945_v30, %v1775_v31  ;;  %v2154_v33 = vpop.f32.mrb[33].mxu1 }
 0xa49   : > { %v1778_v34 = vpop.f32.mrb[34].mxu1 }
 0xa4a   : > { %v1781_v35 = vadd.f32 %v1776_v32, %v2757_v54  ;;  %v2155_v36 = vpop.f32.mrb[35].mxu1 }
 0xa4c   : > { %1782 = vst.msk [vmem:[%s441_s1] sm:$0xff] %vm450_vm0, %v1781_v35 }
 0xa4d   : > { %2325 = shalt.err (!%p2322_p9)
}
 0xa4e   : > { %s2326_s24 = scalar_lea.hbm %s2846_s22, 128  ;;  %s2330_s1 = scalar_lea.hbm %s2903_s13, 256 }
 0xa4f   : > { %p2327_p10 = scmp.ne.s32.totalorder %s2846_s22, %s2326_s24  ;;  %p2331_p13 = scmp.lt.u32.totalorder %s2846_s22, %s2903_s13 }
 0xa50   : > { %p2332_p0 = scmp.lt.u32.totalorder %s2330_s1, %s2326_s24  ;;  %p2334_p2 = scmp.lt.u32.totalorder %s2326_s24, %s2846_s22 }
 0xa51   : > { %p2328_p11 = pnand %p2327_p10, %p2522_p5 }
 0xa52   : > { %p2333_p1 = por %p2332_p0, %p2331_p13 }
 0xa53   : > { %p2329_p12 = pneg %p2328_p11 }
 0xa54   : > { %p2335_p3 = por %p2334_p2, %p2333_p1 }
 0xa56   : > { %p2336_p4 = pnand %p2335_p3, %p2329_p12 }
 0xa58   : > { %2339 = shalt.err (!%p2336_p4)
}
 0xa59   : > { %2157 = dma.vmem_to_hbm [thread:$0]  (%p2522_p5), %s2848_s21, 128, %s2846_s22, %s1788_s29  }
 0xa5a PF: > { %p2167_p7 = scmp.ge.s32.totalorder %s2378_s28, 2  ;;  %s1826_s15 = sand.u32 1, %s2366_s25  }
 0xa5b   : > { %s1827_s16 = scalar_lea.sflag [#allocation4], %s1826_s15 }
 0xa5c   : > { %p2161_p8 = pnand %p2167_p7, %p2526_p6 }
 0xa5e   : > { %2357 = dma.done.wait (!%p2161_p8), %s1827_s16, 16  }
 0xa5f   : > { %2359 = vsyncadd (!%p2161_p8), %s1827_s16, 4294967280  ;;  %s1835_s3 = scalar_lea.sflag [#allocation6], %s1826_s15 }
 0xa60   : > { %2361 = dma.done.wait (!%p2161_p8), %s1835_s3, 128  }
 0xa61   : > { %2363 = vsyncadd (!%p2161_p8), %s1835_s3, 4294967168  ;;  %p27_p5 = scmp.ge.s32.totalorder %s2509_s14, 4   ;;  %s2916_s25 = smov %s2370_s26 }
 0xa62   : > { %s2917_s26 = smov %s2374_s27  ;;  %s2918_s27 = smov %s2520_s17 }
 0xa63   : > { %s2919_s28 = smov %s2509_s14  ;;  %29 = sbr.rel (!%p27_p5) target bundleno = 10 (0xa), region = 120 }
 0xa6a   :  { %1840 = vsyncpa [#allocation4], 1 }
 0xa6b   :  { %1842 = vsyncpa [#allocation4 + $0x1], 1 }
 0xa6c   :  { %1843 = vsyncpa [#allocation6], 1 }
 0xa6d   :  { %1845 = vsyncpa [#allocation6 + $0x1], 1 }

</bundles_post_ra>
